<compile_context>
chip_gen: v7x
topology: tpu7x:2x2x1
jax: 0.10.0
libtpu: 0.0.40
codegen_flags: <defaults>
</compile_context>

<pallas_src>
import math
import jax
import jax.numpy as jnp
from jax.experimental import pallas as pl
from jax.experimental.pallas import tpu as pltpu


# ----------------------------------------------------------------------------
# Pallas kernel: both RITS directions via grid=(2,), whole time loop inside.
# ----------------------------------------------------------------------------
def _brits_kernel(streams_ref, invden_ref,
                  Wgh_ref, bgh_ref, wgx_ref, bgx_ref,
                  Wfused_ref, bhist_ref, Wfeat_ref, bfeat_ref,
                  Wcomb_ref, bcomb_ref, Wih_ref, bgate_ref,
                  imp_ref, loss_ref):
    TB, Fn = imp_ref.shape          # T*B rows, F features
    T = invden_ref.shape[0]
    B = TB // T
    H = Wgh_ref.shape[1]
    H4 = 4 * H

    x_all = streams_ref[0]          # (TB, F) values
    m_all = streams_ref[1]          # masks
    d_all = streams_ref[2]          # deltas
    s1_all = streams_ref[3]         # fourier_s1
    s2_all = streams_ref[4]         # fourier_s2
    invd = invden_ref[...]          # (T, 1)  1/(sum(mask_t)+1e-5), hoisted

    # ---- hoisted batched-over-time computations (independent of h/c) -------
    gamma_h_all = jnp.exp(-jnp.maximum(
        jnp.dot(d_all, Wgh_ref[...], preferred_element_type=jnp.float32)
        + bgh_ref[...], 0.0))                                          # (TB, H)
    gamma_x_all = jnp.exp(-jnp.maximum(d_all * wgx_ref[...] + bgx_ref[...], 0.0))
    alpha_all = (jnp.dot(gamma_x_all, Wcomb_ref[0:Fn, :],
                         preferred_element_type=jnp.float32)
                 + jnp.dot(m_all, Wcomb_ref[Fn:2 * Fn, :],
                           preferred_element_type=jnp.float32)
                 + bcomb_ref[...])                                     # (TB, F)
    gates_static_all = (
        jnp.dot(m_all, Wih_ref[Fn:2 * Fn, :], preferred_element_type=jnp.float32)
        + jnp.dot(s1_all, Wih_ref[2 * Fn:3 * Fn, :], preferred_element_type=jnp.float32)
        + jnp.dot(s2_all, Wih_ref[3 * Fn:4 * Fn, :], preferred_element_type=jnp.float32)
        + bgate_ref[...])                                              # (TB, 4H)

    Wfused = Wfused_ref[...]        # (H, 4H+F): [W_hh | W_hist] (cols [i|f|o|g])
    Wih_cc = Wih_ref[0:Fn, :]       # (F, 4H) — c_c third of the input projection
    Wfeat = Wfeat_ref[...]          # (F, F) zero-diagonal, pre-transposed
    bhist = bhist_ref[...]
    bfeat = bfeat_ref[...]

    h = jnp.zeros((B, H), jnp.float32)
    c = jnp.zeros((B, H), jnp.float32)
    loss_elem = jnp.zeros((B, Fn), jnp.float32)

    # Fully unrolled recurrence: only 3 MXU matmuls per step sit on the serial
    # dependence chain through h (fused hist/hh, feat_reg, LSTM c_c projection).
    for t in range(T):
        r0, r1 = t * B, (t + 1) * B
        x = x_all[r0:r1, :]
        m = m_all[r0:r1, :]
        gh = gamma_h_all[r0:r1, :]
        al = alpha_all[r0:r1, :]
        gs = gates_static_all[r0:r1, :]
        inv = invd[t:t + 1, :]                       # (1, 1)

        h = h * gh
        fused = jnp.dot(h, Wfused, preferred_element_type=jnp.float32)  # (B, 4H+F)
        x_h = fused[:, H4:] + bhist
        x_c = m * x + (1.0 - m) * x_h
        z_h = jnp.dot(x_c, Wfeat, preferred_element_type=jnp.float32) + bfeat
        c_h = al * z_h + (1.0 - al) * x_h
        c_c = m * x + (1.0 - m) * c_h

        gates = gs + fused[:, 0:H4] + jnp.dot(c_c, Wih_cc,
                                              preferred_element_type=jnp.float32)
        ifo = jax.nn.sigmoid(gates[:, 0:3 * H])      # [i | f | o]
        g = jnp.tanh(gates[:, 3 * H:])               # g
        c = ifo[:, H:2 * H] * c + ifo[:, 0:H] * g
        h = ifo[:, 2 * H:3 * H] * jnp.tanh(c)

        # deferred loss: elementwise accumulation, reduced once after the loop
        loss_elem = loss_elem + (jnp.abs(x - x_h) + jnp.abs(x - z_h)
                                 + jnp.abs(x - c_h)) * (m * inv)

        imp_ref[r0:r1, :] = c_c

    loss_ref[...] = jnp.sum(jnp.sum(loss_elem, axis=1, keepdims=True),
                            axis=0, keepdims=True)


# ----------------------------------------------------------------------------
# Parameter init (raw PyTorch-shaped weights) and packing for the kernel.
# ----------------------------------------------------------------------------
def init_raw_params(key, Fn, H):
    ks = jax.random.split(key, 14)
    u = lambda k, shape, b: jax.random.uniform(k, shape, jnp.float32, -b, b)
    sH = 1.0 / math.sqrt(H)
    sF = 1.0 / math.sqrt(Fn)
    s2F = 1.0 / math.sqrt(2 * Fn)
    return dict(
        W_td_h=u(ks[0], (H, Fn), sH),  b_td_h=u(ks[1], (H,), sH),     # TemporalDecay h
        W_td_x=u(ks[2], (Fn, Fn), sF), b_td_x=u(ks[3], (Fn,), sF),    # TemporalDecay x (diag)
        W_hist=u(ks[4], (Fn, H), sH),  b_hist=u(ks[5], (Fn,), sH),    # hist_reg Linear(H,F)
        W_feat=u(ks[6], (Fn, Fn), sF), b_feat=u(ks[7], (Fn,), sF),    # FeatureRegression
        W_comb=u(ks[8], (Fn, 2 * Fn), s2F), b_comb=u(ks[9], (Fn,), s2F),
        W_ih=u(ks[10], (4 * H, 4 * Fn), sH), W_hh=u(ks[11], (4 * H, H), sH),
        b_ih=u(ks[12], (4 * H,), sH),  b_hh=u(ks[13], (4 * H,), sH),
    )


def pack_rits_params(raw):
    """Pre-transpose / fuse / permute the raw weights for the kernel."""
    Fn = raw['W_feat'].shape[0]
    H = raw['W_hh'].shape[1]
    eye = jnp.eye(Fn, dtype=jnp.float32)
    # gate-column permutation: PyTorch [i,f,g,o] -> kernel [i,f,o,g]
    perm = jnp.concatenate([jnp.arange(0, 2 * H),
                            jnp.arange(3 * H, 4 * H),
                            jnp.arange(2 * H, 3 * H)])
    Wih_t = raw['W_ih'].T[:, perm]                          # (4F, 4H)
    Whh_t = raw['W_hh'].T[:, perm]                          # (H, 4H)
    b_gate = (raw['b_ih'] + raw['b_hh'])[perm].reshape(1, 4 * H)   # folded LSTM bias
    W_fused = jnp.concatenate([Whh_t, raw['W_hist'].T], axis=1)    # (H, 4H+F)
    return (
        raw['W_td_h'].T,                                    # Wgh  (F, H)
        raw['b_td_h'].reshape(1, H),                        # bgh
        jnp.diag(raw['W_td_x']).reshape(1, Fn),             # wgx (diag decay)
        raw['b_td_x'].reshape(1, Fn),                       # bgx
        W_fused,                                            # fused hist/hh weight
        raw['b_hist'].reshape(1, Fn),
        (raw['W_feat'] * (1.0 - eye)).T,                    # zero-diag feat reg (F,F)
        raw['b_feat'].reshape(1, Fn),
        raw['W_comb'].T,                                    # (2F, F)
        raw['b_comb'].reshape(1, Fn),
        Wih_t,                                              # (4F, 4H)
        b_gate,                                             # (1, 4H)
    )


# ----------------------------------------------------------------------------
# BRITS forward (fused forward + backward RITS in one pallas_call).
# ----------------------------------------------------------------------------
def brits_forward(data, params_f, params_b):
    """data: (B, 10, T, F); params_*: tuples from pack_rits_params."""
    B, C, T, Fn = data.shape
    TB = T * B

    # One transpose of the whole tensor instead of 10 per-channel transposes:
    # (B,10,T,F) -> (10,T,B,F) -> (2 directions, 5 streams, T*B, F)
    streams = jnp.transpose(data, (1, 2, 0, 3)).reshape(2, 5, TB, Fn)

    # Hoisted per-step 1/(sum(mask_t)+1e-5) for both directions: (2, T, 1)
    masks_fb = jnp.stack([data[:, 1], data[:, 6]], axis=0)          # (2, B, T, F)
    inv_den = (1.0 / (jnp.sum(masks_fb, axis=(1, 3)) + 1e-5))[:, :, None]

    # Stack forward/backward params along a leading direction axis.
    params = tuple(jnp.stack([pf, pb], axis=0) for pf, pb in zip(params_f, params_b))

    stream_spec = pl.BlockSpec((None, 5, TB, Fn), lambda d: (d, 0, 0, 0))
    invden_spec = pl.BlockSpec((None, T, 1), lambda d: (d, 0, 0))
    param_specs = [pl.BlockSpec((None,) + p.shape[1:], lambda d: (d, 0, 0))
                   for p in params]

    # NOTE: all streams + imputations stay fully VMEM-resident (fine at these
    # sizes). If T*B*F scales up (v7x has only 64 MiB physical VMEM), block the
    # time axis with an extra grid dimension and keep h/c in scratch.
    imp, loss = pl.pallas_call(
        _brits_kernel,
        out_shape=(jax.ShapeDtypeStruct((2, TB, Fn), jnp.float32),
                   jax.ShapeDtypeStruct((2, 1, 1), jnp.float32)),
        grid=(2,),
        in_specs=[stream_spec, invden_spec] + param_specs,
        out_specs=(pl.BlockSpec((None, TB, Fn), lambda d: (d, 0, 0)),
                   pl.BlockSpec((None, 1, 1), lambda d: (d, 0, 0))),
        compiler_params=pltpu.CompilerParams(
            dimension_semantics=("parallel",)),   # both directions -> 2 TCs on v7x
    )(streams, inv_den, *params)

    imp = imp.reshape(2, T, B, Fn)
    imp_f = jnp.transpose(imp[0], (1, 0, 2))                 # (B, T, F)
    imp_b = jnp.transpose(imp[1], (1, 0, 2))[:, ::-1, :]     # reverse backward in time

    loss_c = jnp.mean(jnp.abs(imp_f - imp_b)) * 0.1
    total_loss = loss[0, 0, 0] + loss[1, 0, 0] + loss_c
    imputations = (imp_f + imp_b) * 0.5
    return {'loss': total_loss, 'imputations': imputations}


# TODO(synk): the dropout / `out` Linear layers of `rits` are defined but never
# used in the reference forward pass, so they are intentionally omitted.


# ----------------------------------------------------------------------------
# Pure-JAX reference (mirrors the PyTorch module) for a correctness check.
# ----------------------------------------------------------------------------
def _rits_reference(raw, values, masks, deltas, s1, s2):
    B, T, Fn = values.shape
    H = raw['W_hh'].shape[1]
    eye = jnp.eye(Fn, dtype=jnp.float32)
    h = jnp.zeros((B, H), jnp.float32)
    c = jnp.zeros((B, H), jnp.float32)
    loss = 0.0
    imps = []
    for t in range(T):
        x, m, d = values[:, t], masks[:, t], deltas[:, t]
        f1, f2 = s1[:, t], s2[:, t]
        gamma_h = jnp.exp(-jax.nn.relu(d @ raw['W_td_h'].T + raw['b_td_h']))
        gamma_x = jnp.exp(-jax.nn.relu(d @ (raw['W_td_x'] * eye).T + raw['b_td_x']))
        h = h * gamma_h
        x_h = h @ raw['W_hist'].T + raw['b_hist']
        den = jnp.sum(m) + 1e-5
        loss = loss + jnp.sum(jnp.abs(x - x_h) * m) / den
        x_c = m * x + (1 - m) * x_h
        z_h = x_c @ (raw['W_feat'] * (1 - eye)).T + raw['b_feat']
        loss = loss + jnp.sum(jnp.abs(x - z_h) * m) / den
        alpha = jnp.concatenate([gamma_x, m], axis=1) @ raw['W_comb'].T + raw['b_comb']
        c_h = alpha * z_h + (1 - alpha) * x_h
        loss = loss + jnp.sum(jnp.abs(x - c_h) * m) / den
        c_c = m * x + (1 - m) * c_h
        gates = (jnp.concatenate([c_c, m, f1, f2], axis=1) @ raw['W_ih'].T
                 + raw['b_ih'] + h @ raw['W_hh'].T + raw['b_hh'])
        i_g = jax.nn.sigmoid(gates[:, 0:H])
        f_g = jax.nn.sigmoid(gates[:, H:2 * H])
        g_g = jnp.tanh(gates[:, 2 * H:3 * H])
        o_g = jax.nn.sigmoid(gates[:, 3 * H:4 * H])
        c = f_g * c + i_g * g_g
        h = o_g * jnp.tanh(c)
        imps.append(c_c[:, None, :])
    return jnp.concatenate(imps, axis=1), loss


def brits_reference(data, raw_f, raw_b):
    fwd = tuple(data[:, i] for i in range(5))
    bwd = tuple(data[:, 5 + i] for i in range(5))
    imp_f, lf = _rits_reference(raw_f, *fwd)
    imp_b, lb = _rits_reference(raw_b, *bwd)
    imp_b = imp_b[:, ::-1, :]
    loss_c = jnp.mean(jnp.abs(imp_f - imp_b)) * 0.1
    return {'loss': lf + lb + loss_c, 'imputations': (imp_f + imp_b) / 2}


if __name__ == "__main__":
    B, T, Fn, H = 2, 8, 8, 32  # batch, seq_len, num_features, rnn_hid_size

    key = jax.random.PRNGKey(0)
    k_data, k_mask, k_f, k_b = jax.random.split(key, 4)

    data = jax.random.normal(k_data, (B, 10, T, Fn), jnp.float32)
    # masks must be {0,1}; backward channel is the time-reversed forward mask
    masks = (jax.random.uniform(k_mask, (B, T, Fn)) > 0.3).astype(jnp.float32)
    data = data.at[:, 1].set(masks)
    data = data.at[:, 6].set(masks[:, ::-1, :])
    # deltas are non-negative time gaps
    data = data.at[:, 2].set(jnp.abs(data[:, 2]))
    data = data.at[:, 7].set(jnp.abs(data[:, 7]))

    raw_f = init_raw_params(k_f, Fn, H)
    raw_b = init_raw_params(k_b, Fn, H)
    params_f = pack_rits_params(raw_f)
    params_b = pack_rits_params(raw_b)

    out = jax.jit(brits_forward)(data, params_f, params_b)
    jax.block_until_ready(out)

    assert out['imputations'].shape == (B, T, Fn)
    assert out['loss'].shape == ()

    # correctness check against the pure-JAX reference (loose tol: f32 matmuls
    # may take different MXU precision paths inside vs outside the kernel)
    ref = jax.jit(brits_reference)(data, raw_f, raw_b)
    err_imp = float(jnp.max(jnp.abs(out['imputations'] - ref['imputations'])))
    err_loss = float(jnp.abs(out['loss'] - ref['loss']) /
                     jnp.maximum(jnp.abs(ref['loss']), 1.0))
    assert err_imp < 5e-2 and err_loss < 5e-2, (err_imp, err_loss)

    print("KERNEL_OK")
</pallas_src>

<mosaic_0001>
module attributes {stable_mosaic.version = 11 : i64} {
  func.func @_brits_kernel(%arg0: i32, %arg1: memref<1x5x16x8xf32, #tpu.memory_space<vmem>>, %arg2: memref<1x8x1xf32, #tpu.memory_space<vmem>>, %arg3: memref<1x8x32xf32, #tpu.memory_space<vmem>>, %arg4: memref<1x1x32xf32, #tpu.memory_space<vmem>>, %arg5: memref<1x1x8xf32, #tpu.memory_space<vmem>>, %arg6: memref<1x1x8xf32, #tpu.memory_space<vmem>>, %arg7: memref<1x32x136xf32, #tpu.memory_space<vmem>>, %arg8: memref<1x1x8xf32, #tpu.memory_space<vmem>>, %arg9: memref<1x8x8xf32, #tpu.memory_space<vmem>>, %arg10: memref<1x1x8xf32, #tpu.memory_space<vmem>>, %arg11: memref<1x16x8xf32, #tpu.memory_space<vmem>>, %arg12: memref<1x1x8xf32, #tpu.memory_space<vmem>>, %arg13: memref<1x32x128xf32, #tpu.memory_space<vmem>>, %arg14: memref<1x1x128xf32, #tpu.memory_space<vmem>>, %arg15: memref<1x16x8xf32, #tpu.memory_space<vmem>>, %arg16: memref<1x1x1xf32, #tpu.memory_space<vmem>>) attributes {dimension_semantics = [#tpu.dimension_semantics<parallel>], iteration_bounds = array<i64: 2>, scalar_prefetch = 0 : i64, scratch_operands = 0 : i64, tpu.core_type = #tpu.core_type<tc>, window_params = [{transform_indices = @transform_0, window_bounds = array<i64: 1, 5, 16, 8>}, {transform_indices = @transform_1, window_bounds = array<i64: 1, 8, 1>}, {transform_indices = @transform_2, window_bounds = array<i64: 1, 8, 32>}, {transform_indices = @transform_3, window_bounds = array<i64: 1, 1, 32>}, {transform_indices = @transform_4, window_bounds = array<i64: 1, 1, 8>}, {transform_indices = @transform_5, window_bounds = array<i64: 1, 1, 8>}, {transform_indices = @transform_6, window_bounds = array<i64: 1, 32, 136>}, {transform_indices = @transform_7, window_bounds = array<i64: 1, 1, 8>}, {transform_indices = @transform_8, window_bounds = array<i64: 1, 8, 8>}, {transform_indices = @transform_9, window_bounds = array<i64: 1, 1, 8>}, {transform_indices = @transform_10, window_bounds = array<i64: 1, 16, 8>}, {transform_indices = @transform_11, window_bounds = array<i64: 1, 1, 8>}, {transform_indices = @transform_12, window_bounds = array<i64: 1, 32, 128>}, {transform_indices = @transform_13, window_bounds = array<i64: 1, 1, 128>}, {transform_indices = @transform_14, window_bounds = array<i64: 1, 16, 8>}, {transform_indices = @transform_15, window_bounds = array<i64: 1, 1, 1>}]} {
    %c0 = arith.constant 0 : index
    %c0_0 = arith.constant 0 : index
    %c0_1 = arith.constant 0 : index
    %c0_2 = arith.constant 0 : index
    %0 = vector.load %arg1[%c0, %c0_0, %c0_1, %c0_2] : memref<1x5x16x8xf32, #tpu.memory_space<vmem>>, vector<1x1x16x8xf32>
    %1 = vector.shape_cast %0 : vector<1x1x16x8xf32> to vector<16x8xf32>
    %c0_3 = arith.constant 0 : index
    %c1 = arith.constant 1 : index
    %c0_4 = arith.constant 0 : index
    %c0_5 = arith.constant 0 : index
    %2 = vector.load %arg1[%c0_3, %c1, %c0_4, %c0_5] : memref<1x5x16x8xf32, #tpu.memory_space<vmem>>, vector<1x1x16x8xf32>
    %3 = vector.shape_cast %2 : vector<1x1x16x8xf32> to vector<16x8xf32>
    %c0_6 = arith.constant 0 : index
    %c2 = arith.constant 2 : index
    %c0_7 = arith.constant 0 : index
    %c0_8 = arith.constant 0 : index
    %4 = vector.load %arg1[%c0_6, %c2, %c0_7, %c0_8] : memref<1x5x16x8xf32, #tpu.memory_space<vmem>>, vector<1x1x16x8xf32>
    %5 = vector.shape_cast %4 : vector<1x1x16x8xf32> to vector<16x8xf32>
    %c0_9 = arith.constant 0 : index
    %c3 = arith.constant 3 : index
    %c0_10 = arith.constant 0 : index
    %c0_11 = arith.constant 0 : index
    %6 = vector.load %arg1[%c0_9, %c3, %c0_10, %c0_11] : memref<1x5x16x8xf32, #tpu.memory_space<vmem>>, vector<1x1x16x8xf32>
    %7 = vector.shape_cast %6 : vector<1x1x16x8xf32> to vector<16x8xf32>
    %c0_12 = arith.constant 0 : index
    %c4 = arith.constant 4 : index
    %c0_13 = arith.constant 0 : index
    %c0_14 = arith.constant 0 : index
    %8 = vector.load %arg1[%c0_12, %c4, %c0_13, %c0_14] : memref<1x5x16x8xf32, #tpu.memory_space<vmem>>, vector<1x1x16x8xf32>
    %9 = vector.shape_cast %8 : vector<1x1x16x8xf32> to vector<16x8xf32>
    %c0_15 = arith.constant 0 : index
    %c0_16 = arith.constant 0 : index
    %c0_17 = arith.constant 0 : index
    %10 = vector.load %arg2[%c0_15, %c0_16, %c0_17] : memref<1x8x1xf32, #tpu.memory_space<vmem>>, vector<1x8x1xf32>
    %11 = vector.shape_cast %10 : vector<1x8x1xf32> to vector<8x1xf32>
    %c0_18 = arith.constant 0 : index
    %c0_19 = arith.constant 0 : index
    %c0_20 = arith.constant 0 : index
    %12 = vector.load %arg3[%c0_18, %c0_19, %c0_20] : memref<1x8x32xf32, #tpu.memory_space<vmem>>, vector<1x8x32xf32>
    %13 = vector.shape_cast %12 : vector<1x8x32xf32> to vector<8x32xf32>
    %cst = arith.constant dense<0.000000e+00> : vector<16x32xf32>
    %14 = tpu.matmul %5, %13, %cst {dimension_numbers = #tpu.dot_dimension_numbers<[1], [0], [0], [1], [0, 0, 1, 1], [], []>} : vector<16x8xf32>, vector<8x32xf32>, vector<16x32xf32> -> vector<16x32xf32>
    %c0_21 = arith.constant 0 : index
    %c0_22 = arith.constant 0 : index
    %c0_23 = arith.constant 0 : index
    %15 = vector.load %arg4[%c0_21, %c0_22, %c0_23] : memref<1x1x32xf32, #tpu.memory_space<vmem>>, vector<1x1x32xf32>
    %16 = vector.shape_cast %15 : vector<1x1x32xf32> to vector<1x32xf32>
    %17 = vector.broadcast %16 : vector<1x32xf32> to vector<16x32xf32>
    %18 = arith.addf %14, %17 : vector<16x32xf32>
    %cst_24 = arith.constant 0.000000e+00 : f32
    %19 = vector.broadcast %cst_24 : f32 to vector<16x32xf32>
    %20 = arith.maximumf %18, %19 : vector<16x32xf32>
    %cst_25 = arith.constant 0.000000e+00 : f32
    %21 = vector.broadcast %cst_25 : f32 to vector<16x32xf32>
    %22 = arith.subf %21, %20 : vector<16x32xf32>
    %23 = math.exp %22 : vector<16x32xf32>
    %c0_26 = arith.constant 0 : index
    %c0_27 = arith.constant 0 : index
    %c0_28 = arith.constant 0 : index
    %24 = vector.load %arg5[%c0_26, %c0_27, %c0_28] : memref<1x1x8xf32, #tpu.memory_space<vmem>>, vector<1x1x8xf32>
    %25 = vector.shape_cast %24 : vector<1x1x8xf32> to vector<1x8xf32>
    %26 = vector.broadcast %25 : vector<1x8xf32> to vector<16x8xf32>
    %27 = arith.mulf %5, %26 : vector<16x8xf32>
    %c0_29 = arith.constant 0 : index
    %c0_30 = arith.constant 0 : index
    %c0_31 = arith.constant 0 : index
    %28 = vector.load %arg6[%c0_29, %c0_30, %c0_31] : memref<1x1x8xf32, #tpu.memory_space<vmem>>, vector<1x1x8xf32>
    %29 = vector.shape_cast %28 : vector<1x1x8xf32> to vector<1x8xf32>
    %30 = vector.broadcast %29 : vector<1x8xf32> to vector<16x8xf32>
    %31 = arith.addf %27, %30 : vector<16x8xf32>
    %cst_32 = arith.constant 0.000000e+00 : f32
    %32 = vector.broadcast %cst_32 : f32 to vector<16x8xf32>
    %33 = arith.maximumf %31, %32 : vector<16x8xf32>
    %cst_33 = arith.constant 0.000000e+00 : f32
    %34 = vector.broadcast %cst_33 : f32 to vector<16x8xf32>
    %35 = arith.subf %34, %33 : vector<16x8xf32>
    %36 = math.exp %35 : vector<16x8xf32>
    %c0_34 = arith.constant 0 : index
    %c0_35 = arith.constant 0 : index
    %c0_36 = arith.constant 0 : index
    %37 = vector.load %arg11[%c0_34, %c0_35, %c0_36] : memref<1x16x8xf32, #tpu.memory_space<vmem>>, vector<1x8x8xf32>
    %38 = vector.shape_cast %37 : vector<1x8x8xf32> to vector<8x8xf32>
    %cst_37 = arith.constant dense<0.000000e+00> : vector<16x8xf32>
    %39 = tpu.matmul %36, %38, %cst_37 {dimension_numbers = #tpu.dot_dimension_numbers<[1], [0], [0], [1], [0, 0, 1, 1], [], []>} : vector<16x8xf32>, vector<8x8xf32>, vector<16x8xf32> -> vector<16x8xf32>
    %c0_38 = arith.constant 0 : index
    %c8 = arith.constant 8 : index
    %c0_39 = arith.constant 0 : index
    %40 = vector.load %arg11[%c0_38, %c8, %c0_39] : memref<1x16x8xf32, #tpu.memory_space<vmem>>, vector<1x8x8xf32>
    %41 = vector.shape_cast %40 : vector<1x8x8xf32> to vector<8x8xf32>
    %cst_40 = arith.constant dense<0.000000e+00> : vector<16x8xf32>
    %42 = tpu.matmul %3, %41, %cst_40 {dimension_numbers = #tpu.dot_dimension_numbers<[1], [0], [0], [1], [0, 0, 1, 1], [], []>} : vector<16x8xf32>, vector<8x8xf32>, vector<16x8xf32> -> vector<16x8xf32>
    %43 = arith.addf %39, %42 : vector<16x8xf32>
    %c0_41 = arith.constant 0 : index
    %c0_42 = arith.constant 0 : index
    %c0_43 = arith.constant 0 : index
    %44 = vector.load %arg12[%c0_41, %c0_42, %c0_43] : memref<1x1x8xf32, #tpu.memory_space<vmem>>, vector<1x1x8xf32>
    %45 = vector.shape_cast %44 : vector<1x1x8xf32> to vector<1x8xf32>
    %46 = vector.broadcast %45 : vector<1x8xf32> to vector<16x8xf32>
    %47 = arith.addf %43, %46 : vector<16x8xf32>
    %c0_44 = arith.constant 0 : index
    %c8_45 = arith.constant 8 : index
    %c0_46 = arith.constant 0 : index
    %48 = vector.load %arg13[%c0_44, %c8_45, %c0_46] : memref<1x32x128xf32, #tpu.memory_space<vmem>>, vector<1x8x128xf32>
    %49 = vector.shape_cast %48 : vector<1x8x128xf32> to vector<8x128xf32>
    %cst_47 = arith.constant dense<0.000000e+00> : vector<16x128xf32>
    %50 = tpu.matmul %3, %49, %cst_47 {dimension_numbers = #tpu.dot_dimension_numbers<[1], [0], [0], [1], [0, 0, 1, 1], [], []>} : vector<16x8xf32>, vector<8x128xf32>, vector<16x128xf32> -> vector<16x128xf32>
    %c0_48 = arith.constant 0 : index
    %c16 = arith.constant 16 : index
    %c0_49 = arith.constant 0 : index
    %51 = vector.load %arg13[%c0_48, %c16, %c0_49] : memref<1x32x128xf32, #tpu.memory_space<vmem>>, vector<1x8x128xf32>
    %52 = vector.shape_cast %51 : vector<1x8x128xf32> to vector<8x128xf32>
    %cst_50 = arith.constant dense<0.000000e+00> : vector<16x128xf32>
    %53 = tpu.matmul %7, %52, %cst_50 {dimension_numbers = #tpu.dot_dimension_numbers<[1], [0], [0], [1], [0, 0, 1, 1], [], []>} : vector<16x8xf32>, vector<8x128xf32>, vector<16x128xf32> -> vector<16x128xf32>
    %54 = arith.addf %50, %53 : vector<16x128xf32>
    %c0_51 = arith.constant 0 : index
    %c24 = arith.constant 24 : index
    %c0_52 = arith.constant 0 : index
    %55 = vector.load %arg13[%c0_51, %c24, %c0_52] : memref<1x32x128xf32, #tpu.memory_space<vmem>>, vector<1x8x128xf32>
    %56 = vector.shape_cast %55 : vector<1x8x128xf32> to vector<8x128xf32>
    %cst_53 = arith.constant dense<0.000000e+00> : vector<16x128xf32>
    %57 = tpu.matmul %9, %56, %cst_53 {dimension_numbers = #tpu.dot_dimension_numbers<[1], [0], [0], [1], [0, 0, 1, 1], [], []>} : vector<16x8xf32>, vector<8x128xf32>, vector<16x128xf32> -> vector<16x128xf32>
    %58 = arith.addf %54, %57 : vector<16x128xf32>
    %c0_54 = arith.constant 0 : index
    %c0_55 = arith.constant 0 : index
    %c0_56 = arith.constant 0 : index
    %59 = vector.load %arg14[%c0_54, %c0_55, %c0_56] : memref<1x1x128xf32, #tpu.memory_space<vmem>>, vector<1x1x128xf32>
    %60 = vector.shape_cast %59 : vector<1x1x128xf32> to vector<1x128xf32>
    %61 = vector.broadcast %60 : vector<1x128xf32> to vector<16x128xf32>
    %62 = arith.addf %58, %61 : vector<16x128xf32>
    %c0_57 = arith.constant 0 : index
    %c0_58 = arith.constant 0 : index
    %c0_59 = arith.constant 0 : index
    %63 = vector.load %arg7[%c0_57, %c0_58, %c0_59] : memref<1x32x136xf32, #tpu.memory_space<vmem>>, vector<1x32x136xf32>
    %64 = vector.shape_cast %63 : vector<1x32x136xf32> to vector<32x136xf32>
    %c0_60 = arith.constant 0 : index
    %c0_61 = arith.constant 0 : index
    %c0_62 = arith.constant 0 : index
    %65 = vector.load %arg13[%c0_60, %c0_61, %c0_62] : memref<1x32x128xf32, #tpu.memory_space<vmem>>, vector<1x8x128xf32>
    %66 = vector.shape_cast %65 : vector<1x8x128xf32> to vector<8x128xf32>
    %c0_63 = arith.constant 0 : index
    %c0_64 = arith.constant 0 : index
    %c0_65 = arith.constant 0 : index
    %67 = vector.load %arg9[%c0_63, %c0_64, %c0_65] : memref<1x8x8xf32, #tpu.memory_space<vmem>>, vector<1x8x8xf32>
    %68 = vector.shape_cast %67 : vector<1x8x8xf32> to vector<8x8xf32>
    %c0_66 = arith.constant 0 : index
    %c0_67 = arith.constant 0 : index
    %c0_68 = arith.constant 0 : index
    %69 = vector.load %arg8[%c0_66, %c0_67, %c0_68] : memref<1x1x8xf32, #tpu.memory_space<vmem>>, vector<1x1x8xf32>
    %70 = vector.shape_cast %69 : vector<1x1x8xf32> to vector<1x8xf32>
    %c0_69 = arith.constant 0 : index
    %c0_70 = arith.constant 0 : index
    %c0_71 = arith.constant 0 : index
    %71 = vector.load %arg10[%c0_69, %c0_70, %c0_71] : memref<1x1x8xf32, #tpu.memory_space<vmem>>, vector<1x1x8xf32>
    %72 = vector.shape_cast %71 : vector<1x1x8xf32> to vector<1x8xf32>
    %cst_72 = arith.constant 0.000000e+00 : f32
    %73 = vector.broadcast %cst_72 : f32 to vector<2x32xf32>
    %cst_73 = arith.constant 0.000000e+00 : f32
    %74 = vector.broadcast %cst_73 : f32 to vector<2x32xf32>
    %cst_74 = arith.constant 0.000000e+00 : f32
    %75 = vector.broadcast %cst_74 : f32 to vector<2x8xf32>
    %76 = vector.extract_strided_slice %1 {offsets = [0, 0], sizes = [2, 8], strides = [1, 1]} : vector<16x8xf32> to vector<2x8xf32>
    %77 = vector.extract_strided_slice %3 {offsets = [0, 0], sizes = [2, 8], strides = [1, 1]} : vector<16x8xf32> to vector<2x8xf32>
    %78 = vector.extract_strided_slice %23 {offsets = [0, 0], sizes = [2, 32], strides = [1, 1]} : vector<16x32xf32> to vector<2x32xf32>
    %79 = vector.extract_strided_slice %47 {offsets = [0, 0], sizes = [2, 8], strides = [1, 1]} : vector<16x8xf32> to vector<2x8xf32>
    %80 = vector.extract_strided_slice %62 {offsets = [0, 0], sizes = [2, 128], strides = [1, 1]} : vector<16x128xf32> to vector<2x128xf32>
    %81 = vector.extract_strided_slice %11 {offsets = [0, 0], sizes = [1, 1], strides = [1, 1]} : vector<8x1xf32> to vector<1x1xf32>
    %82 = arith.mulf %73, %78 : vector<2x32xf32>
    %cst_75 = arith.constant dense<0.000000e+00> : vector<2x136xf32>
    %83 = tpu.matmul %82, %64, %cst_75 {dimension_numbers = #tpu.dot_dimension_numbers<[1], [0], [0], [1], [0, 0, 1, 1], [], []>} : vector<2x32xf32>, vector<32x136xf32>, vector<2x136xf32> -> vector<2x136xf32>
    %84 = vector.extract_strided_slice %83 {offsets = [0, 128], sizes = [2, 8], strides = [1, 1]} : vector<2x136xf32> to vector<2x8xf32>
    %85 = vector.broadcast %70 : vector<1x8xf32> to vector<2x8xf32>
    %86 = arith.addf %84, %85 : vector<2x8xf32>
    %87 = arith.mulf %77, %76 : vector<2x8xf32>
    %cst_76 = arith.constant 1.000000e+00 : f32
    %88 = vector.broadcast %cst_76 : f32 to vector<2x8xf32>
    %89 = arith.subf %88, %77 : vector<2x8xf32>
    %90 = arith.mulf %89, %86 : vector<2x8xf32>
    %91 = arith.addf %87, %90 : vector<2x8xf32>
    %cst_77 = arith.constant dense<0.000000e+00> : vector<2x8xf32>
    %92 = tpu.matmul %91, %68, %cst_77 {dimension_numbers = #tpu.dot_dimension_numbers<[1], [0], [0], [1], [0, 0, 1, 1], [], []>} : vector<2x8xf32>, vector<8x8xf32>, vector<2x8xf32> -> vector<2x8xf32>
    %93 = vector.broadcast %72 : vector<1x8xf32> to vector<2x8xf32>
    %94 = arith.addf %92, %93 : vector<2x8xf32>
    %95 = arith.mulf %79, %94 : vector<2x8xf32>
    %cst_78 = arith.constant 1.000000e+00 : f32
    %96 = vector.broadcast %cst_78 : f32 to vector<2x8xf32>
    %97 = arith.subf %96, %79 : vector<2x8xf32>
    %98 = arith.mulf %97, %86 : vector<2x8xf32>
    %99 = arith.addf %95, %98 : vector<2x8xf32>
    %100 = arith.mulf %77, %76 : vector<2x8xf32>
    %cst_79 = arith.constant 1.000000e+00 : f32
    %101 = vector.broadcast %cst_79 : f32 to vector<2x8xf32>
    %102 = arith.subf %101, %77 : vector<2x8xf32>
    %103 = arith.mulf %102, %99 : vector<2x8xf32>
    %104 = arith.addf %100, %103 : vector<2x8xf32>
    %105 = vector.extract_strided_slice %83 {offsets = [0, 0], sizes = [2, 128], strides = [1, 1]} : vector<2x136xf32> to vector<2x128xf32>
    %106 = arith.addf %80, %105 : vector<2x128xf32>
    %cst_80 = arith.constant dense<0.000000e+00> : vector<2x128xf32>
    %107 = tpu.matmul %104, %66, %cst_80 {dimension_numbers = #tpu.dot_dimension_numbers<[1], [0], [0], [1], [0, 0, 1, 1], [], []>} : vector<2x8xf32>, vector<8x128xf32>, vector<2x128xf32> -> vector<2x128xf32>
    %108 = arith.addf %106, %107 : vector<2x128xf32>
    %109 = vector.extract_strided_slice %108 {offsets = [0, 0], sizes = [2, 96], strides = [1, 1]} : vector<2x128xf32> to vector<2x96xf32>
    %110 = arith.negf %109 : vector<2x96xf32>
    %111 = math.exp %110 : vector<2x96xf32>
    %cst_81 = arith.constant 1.000000e+00 : f32
    %112 = vector.broadcast %cst_81 : f32 to vector<2x96xf32>
    %113 = arith.addf %112, %111 : vector<2x96xf32>
    %114 = arith.divf %112, %113 : vector<2x96xf32>
    %115 = vector.extract_strided_slice %108 {offsets = [0, 96], sizes = [2, 32], strides = [1, 1]} : vector<2x128xf32> to vector<2x32xf32>
    %116 = math.tanh %115 : vector<2x32xf32>
    %117 = vector.extract_strided_slice %114 {offsets = [0, 32], sizes = [2, 32], strides = [1, 1]} : vector<2x96xf32> to vector<2x32xf32>
    %118 = arith.mulf %117, %74 : vector<2x32xf32>
    %119 = vector.extract_strided_slice %114 {offsets = [0, 0], sizes = [2, 32], strides = [1, 1]} : vector<2x96xf32> to vector<2x32xf32>
    %120 = arith.mulf %119, %116 : vector<2x32xf32>
    %121 = arith.addf %118, %120 : vector<2x32xf32>
    %122 = vector.extract_strided_slice %114 {offsets = [0, 64], sizes = [2, 32], strides = [1, 1]} : vector<2x96xf32> to vector<2x32xf32>
    %123 = math.tanh %121 : vector<2x32xf32>
    %124 = arith.mulf %122, %123 : vector<2x32xf32>
    %125 = arith.subf %76, %86 : vector<2x8xf32>
    %126 = math.absf %125 : vector<2x8xf32>
    %127 = arith.subf %76, %94 : vector<2x8xf32>
    %128 = math.absf %127 : vector<2x8xf32>
    %129 = arith.addf %126, %128 : vector<2x8xf32>
    %130 = arith.subf %76, %99 : vector<2x8xf32>
    %131 = math.absf %130 : vector<2x8xf32>
    %132 = arith.addf %129, %131 : vector<2x8xf32>
    %133 = vector.broadcast %81 : vector<1x1xf32> to vector<2x8xf32>
    %134 = arith.mulf %77, %133 : vector<2x8xf32>
    %135 = arith.mulf %132, %134 : vector<2x8xf32>
    %136 = arith.addf %75, %135 : vector<2x8xf32>
    %c0_82 = arith.constant 0 : index
    %c0_83 = arith.constant 0 : index
    %c0_84 = arith.constant 0 : index
    %137 = vector.load %arg15[%c0_82, %c0_83, %c0_84] : memref<1x16x8xf32, #tpu.memory_space<vmem>>, vector<1x2x8xf32>
    %138 = vector.shape_cast %137 : vector<1x2x8xf32> to vector<2x8xf32>
    %139 = vector.shape_cast %104 : vector<2x8xf32> to vector<1x2x8xf32>
    tpu.vector_store %arg15[%c0_82, %c0_83, %c0_84], %139 {strides = array<i32>} : memref<1x16x8xf32, #tpu.memory_space<vmem>>, vector<1x2x8xf32>,
    %140 = vector.extract_strided_slice %1 {offsets = [2, 0], sizes = [2, 8], strides = [1, 1]} : vector<16x8xf32> to vector<2x8xf32>
    %141 = vector.extract_strided_slice %3 {offsets = [2, 0], sizes = [2, 8], strides = [1, 1]} : vector<16x8xf32> to vector<2x8xf32>
    %142 = vector.extract_strided_slice %23 {offsets = [2, 0], sizes = [2, 32], strides = [1, 1]} : vector<16x32xf32> to vector<2x32xf32>
    %143 = vector.extract_strided_slice %47 {offsets = [2, 0], sizes = [2, 8], strides = [1, 1]} : vector<16x8xf32> to vector<2x8xf32>
    %144 = vector.extract_strided_slice %62 {offsets = [2, 0], sizes = [2, 128], strides = [1, 1]} : vector<16x128xf32> to vector<2x128xf32>
    %145 = vector.extract_strided_slice %11 {offsets = [1, 0], sizes = [1, 1], strides = [1, 1]} : vector<8x1xf32> to vector<1x1xf32>
    %146 = arith.mulf %124, %142 : vector<2x32xf32>
    %cst_85 = arith.constant dense<0.000000e+00> : vector<2x136xf32>
    %147 = tpu.matmul %146, %64, %cst_85 {dimension_numbers = #tpu.dot_dimension_numbers<[1], [0], [0], [1], [0, 0, 1, 1], [], []>} : vector<2x32xf32>, vector<32x136xf32>, vector<2x136xf32> -> vector<2x136xf32>
    %148 = vector.extract_strided_slice %147 {offsets = [0, 128], sizes = [2, 8], strides = [1, 1]} : vector<2x136xf32> to vector<2x8xf32>
    %149 = vector.broadcast %70 : vector<1x8xf32> to vector<2x8xf32>
    %150 = arith.addf %148, %149 : vector<2x8xf32>
    %151 = arith.mulf %141, %140 : vector<2x8xf32>
    %cst_86 = arith.constant 1.000000e+00 : f32
    %152 = vector.broadcast %cst_86 : f32 to vector<2x8xf32>
    %153 = arith.subf %152, %141 : vector<2x8xf32>
    %154 = arith.mulf %153, %150 : vector<2x8xf32>
    %155 = arith.addf %151, %154 : vector<2x8xf32>
    %cst_87 = arith.constant dense<0.000000e+00> : vector<2x8xf32>
    %156 = tpu.matmul %155, %68, %cst_87 {dimension_numbers = #tpu.dot_dimension_numbers<[1], [0], [0], [1], [0, 0, 1, 1], [], []>} : vector<2x8xf32>, vector<8x8xf32>, vector<2x8xf32> -> vector<2x8xf32>
    %157 = vector.broadcast %72 : vector<1x8xf32> to vector<2x8xf32>
    %158 = arith.addf %156, %157 : vector<2x8xf32>
    %159 = arith.mulf %143, %158 : vector<2x8xf32>
    %cst_88 = arith.constant 1.000000e+00 : f32
    %160 = vector.broadcast %cst_88 : f32 to vector<2x8xf32>
    %161 = arith.subf %160, %143 : vector<2x8xf32>
    %162 = arith.mulf %161, %150 : vector<2x8xf32>
    %163 = arith.addf %159, %162 : vector<2x8xf32>
    %164 = arith.mulf %141, %140 : vector<2x8xf32>
    %cst_89 = arith.constant 1.000000e+00 : f32
    %165 = vector.broadcast %cst_89 : f32 to vector<2x8xf32>
    %166 = arith.subf %165, %141 : vector<2x8xf32>
    %167 = arith.mulf %166, %163 : vector<2x8xf32>
    %168 = arith.addf %164, %167 : vector<2x8xf32>
    %169 = vector.extract_strided_slice %147 {offsets = [0, 0], sizes = [2, 128], strides = [1, 1]} : vector<2x136xf32> to vector<2x128xf32>
    %170 = arith.addf %144, %169 : vector<2x128xf32>
    %cst_90 = arith.constant dense<0.000000e+00> : vector<2x128xf32>
    %171 = tpu.matmul %168, %66, %cst_90 {dimension_numbers = #tpu.dot_dimension_numbers<[1], [0], [0], [1], [0, 0, 1, 1], [], []>} : vector<2x8xf32>, vector<8x128xf32>, vector<2x128xf32> -> vector<2x128xf32>
    %172 = arith.addf %170, %171 : vector<2x128xf32>
    %173 = vector.extract_strided_slice %172 {offsets = [0, 0], sizes = [2, 96], strides = [1, 1]} : vector<2x128xf32> to vector<2x96xf32>
    %174 = arith.negf %173 : vector<2x96xf32>
    %175 = math.exp %174 : vector<2x96xf32>
    %cst_91 = arith.constant 1.000000e+00 : f32
    %176 = vector.broadcast %cst_91 : f32 to vector<2x96xf32>
    %177 = arith.addf %176, %175 : vector<2x96xf32>
    %178 = arith.divf %176, %177 : vector<2x96xf32>
    %179 = vector.extract_strided_slice %172 {offsets = [0, 96], sizes = [2, 32], strides = [1, 1]} : vector<2x128xf32> to vector<2x32xf32>
    %180 = math.tanh %179 : vector<2x32xf32>
    %181 = vector.extract_strided_slice %178 {offsets = [0, 32], sizes = [2, 32], strides = [1, 1]} : vector<2x96xf32> to vector<2x32xf32>
    %182 = arith.mulf %181, %121 : vector<2x32xf32>
    %183 = vector.extract_strided_slice %178 {offsets = [0, 0], sizes = [2, 32], strides = [1, 1]} : vector<2x96xf32> to vector<2x32xf32>
    %184 = arith.mulf %183, %180 : vector<2x32xf32>
    %185 = arith.addf %182, %184 : vector<2x32xf32>
    %186 = vector.extract_strided_slice %178 {offsets = [0, 64], sizes = [2, 32], strides = [1, 1]} : vector<2x96xf32> to vector<2x32xf32>
    %187 = math.tanh %185 : vector<2x32xf32>
    %188 = arith.mulf %186, %187 : vector<2x32xf32>
    %189 = arith.subf %140, %150 : vector<2x8xf32>
    %190 = math.absf %189 : vector<2x8xf32>
    %191 = arith.subf %140, %158 : vector<2x8xf32>
    %192 = math.absf %191 : vector<2x8xf32>
    %193 = arith.addf %190, %192 : vector<2x8xf32>
    %194 = arith.subf %140, %163 : vector<2x8xf32>
    %195 = math.absf %194 : vector<2x8xf32>
    %196 = arith.addf %193, %195 : vector<2x8xf32>
    %197 = vector.broadcast %145 : vector<1x1xf32> to vector<2x8xf32>
    %198 = arith.mulf %141, %197 : vector<2x8xf32>
    %199 = arith.mulf %196, %198 : vector<2x8xf32>
    %200 = arith.addf %136, %199 : vector<2x8xf32>
    %c0_92 = arith.constant 0 : index
    %c2_93 = arith.constant 2 : index
    %c0_94 = arith.constant 0 : index
    %201 = vector.load %arg15[%c0_92, %c2_93, %c0_94] : memref<1x16x8xf32, #tpu.memory_space<vmem>>, vector<1x2x8xf32>
    %202 = vector.shape_cast %201 : vector<1x2x8xf32> to vector<2x8xf32>
    %203 = vector.shape_cast %168 : vector<2x8xf32> to vector<1x2x8xf32>
    tpu.vector_store %arg15[%c0_92, %c2_93, %c0_94], %203 {strides = array<i32>} : memref<1x16x8xf32, #tpu.memory_space<vmem>>, vector<1x2x8xf32>,
    %204 = vector.extract_strided_slice %1 {offsets = [4, 0], sizes = [2, 8], strides = [1, 1]} : vector<16x8xf32> to vector<2x8xf32>
    %205 = vector.extract_strided_slice %3 {offsets = [4, 0], sizes = [2, 8], strides = [1, 1]} : vector<16x8xf32> to vector<2x8xf32>
    %206 = vector.extract_strided_slice %23 {offsets = [4, 0], sizes = [2, 32], strides = [1, 1]} : vector<16x32xf32> to vector<2x32xf32>
    %207 = vector.extract_strided_slice %47 {offsets = [4, 0], sizes = [2, 8], strides = [1, 1]} : vector<16x8xf32> to vector<2x8xf32>
    %208 = vector.extract_strided_slice %62 {offsets = [4, 0], sizes = [2, 128], strides = [1, 1]} : vector<16x128xf32> to vector<2x128xf32>
    %209 = vector.extract_strided_slice %11 {offsets = [2, 0], sizes = [1, 1], strides = [1, 1]} : vector<8x1xf32> to vector<1x1xf32>
    %210 = arith.mulf %188, %206 : vector<2x32xf32>
    %cst_95 = arith.constant dense<0.000000e+00> : vector<2x136xf32>
    %211 = tpu.matmul %210, %64, %cst_95 {dimension_numbers = #tpu.dot_dimension_numbers<[1], [0], [0], [1], [0, 0, 1, 1], [], []>} : vector<2x32xf32>, vector<32x136xf32>, vector<2x136xf32> -> vector<2x136xf32>
    %212 = vector.extract_strided_slice %211 {offsets = [0, 128], sizes = [2, 8], strides = [1, 1]} : vector<2x136xf32> to vector<2x8xf32>
    %213 = vector.broadcast %70 : vector<1x8xf32> to vector<2x8xf32>
    %214 = arith.addf %212, %213 : vector<2x8xf32>
    %215 = arith.mulf %205, %204 : vector<2x8xf32>
    %cst_96 = arith.constant 1.000000e+00 : f32
    %216 = vector.broadcast %cst_96 : f32 to vector<2x8xf32>
    %217 = arith.subf %216, %205 : vector<2x8xf32>
    %218 = arith.mulf %217, %214 : vector<2x8xf32>
    %219 = arith.addf %215, %218 : vector<2x8xf32>
    %cst_97 = arith.constant dense<0.000000e+00> : vector<2x8xf32>
    %220 = tpu.matmul %219, %68, %cst_97 {dimension_numbers = #tpu.dot_dimension_numbers<[1], [0], [0], [1], [0, 0, 1, 1], [], []>} : vector<2x8xf32>, vector<8x8xf32>, vector<2x8xf32> -> vector<2x8xf32>
    %221 = vector.broadcast %72 : vector<1x8xf32> to vector<2x8xf32>
    %222 = arith.addf %220, %221 : vector<2x8xf32>
    %223 = arith.mulf %207, %222 : vector<2x8xf32>
    %cst_98 = arith.constant 1.000000e+00 : f32
    %224 = vector.broadcast %cst_98 : f32 to vector<2x8xf32>
    %225 = arith.subf %224, %207 : vector<2x8xf32>
    %226 = arith.mulf %225, %214 : vector<2x8xf32>
    %227 = arith.addf %223, %226 : vector<2x8xf32>
    %228 = arith.mulf %205, %204 : vector<2x8xf32>
    %cst_99 = arith.constant 1.000000e+00 : f32
    %229 = vector.broadcast %cst_99 : f32 to vector<2x8xf32>
    %230 = arith.subf %229, %205 : vector<2x8xf32>
    %231 = arith.mulf %230, %227 : vector<2x8xf32>
    %232 = arith.addf %228, %231 : vector<2x8xf32>
    %233 = vector.extract_strided_slice %211 {offsets = [0, 0], sizes = [2, 128], strides = [1, 1]} : vector<2x136xf32> to vector<2x128xf32>
    %234 = arith.addf %208, %233 : vector<2x128xf32>
    %cst_100 = arith.constant dense<0.000000e+00> : vector<2x128xf32>
    %235 = tpu.matmul %232, %66, %cst_100 {dimension_numbers = #tpu.dot_dimension_numbers<[1], [0], [0], [1], [0, 0, 1, 1], [], []>} : vector<2x8xf32>, vector<8x128xf32>, vector<2x128xf32> -> vector<2x128xf32>
    %236 = arith.addf %234, %235 : vector<2x128xf32>
    %237 = vector.extract_strided_slice %236 {offsets = [0, 0], sizes = [2, 96], strides = [1, 1]} : vector<2x128xf32> to vector<2x96xf32>
    %238 = arith.negf %237 : vector<2x96xf32>
    %239 = math.exp %238 : vector<2x96xf32>
    %cst_101 = arith.constant 1.000000e+00 : f32
    %240 = vector.broadcast %cst_101 : f32 to vector<2x96xf32>
    %241 = arith.addf %240, %239 : vector<2x96xf32>
    %242 = arith.divf %240, %241 : vector<2x96xf32>
    %243 = vector.extract_strided_slice %236 {offsets = [0, 96], sizes = [2, 32], strides = [1, 1]} : vector<2x128xf32> to vector<2x32xf32>
    %244 = math.tanh %243 : vector<2x32xf32>
    %245 = vector.extract_strided_slice %242 {offsets = [0, 32], sizes = [2, 32], strides = [1, 1]} : vector<2x96xf32> to vector<2x32xf32>
    %246 = arith.mulf %245, %185 : vector<2x32xf32>
    %247 = vector.extract_strided_slice %242 {offsets = [0, 0], sizes = [2, 32], strides = [1, 1]} : vector<2x96xf32> to vector<2x32xf32>
    %248 = arith.mulf %247, %244 : vector<2x32xf32>
    %249 = arith.addf %246, %248 : vector<2x32xf32>
    %250 = vector.extract_strided_slice %242 {offsets = [0, 64], sizes = [2, 32], strides = [1, 1]} : vector<2x96xf32> to vector<2x32xf32>
    %251 = math.tanh %249 : vector<2x32xf32>
    %252 = arith.mulf %250, %251 : vector<2x32xf32>
    %253 = arith.subf %204, %214 : vector<2x8xf32>
    %254 = math.absf %253 : vector<2x8xf32>
    %255 = arith.subf %204, %222 : vector<2x8xf32>
    %256 = math.absf %255 : vector<2x8xf32>
    %257 = arith.addf %254, %256 : vector<2x8xf32>
    %258 = arith.subf %204, %227 : vector<2x8xf32>
    %259 = math.absf %258 : vector<2x8xf32>
    %260 = arith.addf %257, %259 : vector<2x8xf32>
    %261 = vector.broadcast %209 : vector<1x1xf32> to vector<2x8xf32>
    %262 = arith.mulf %205, %261 : vector<2x8xf32>
    %263 = arith.mulf %260, %262 : vector<2x8xf32>
    %264 = arith.addf %200, %263 : vector<2x8xf32>
    %c0_102 = arith.constant 0 : index
    %c4_103 = arith.constant 4 : index
    %c0_104 = arith.constant 0 : index
    %265 = vector.load %arg15[%c0_102, %c4_103, %c0_104] : memref<1x16x8xf32, #tpu.memory_space<vmem>>, vector<1x2x8xf32>
    %266 = vector.shape_cast %265 : vector<1x2x8xf32> to vector<2x8xf32>
    %267 = vector.shape_cast %232 : vector<2x8xf32> to vector<1x2x8xf32>
    tpu.vector_store %arg15[%c0_102, %c4_103, %c0_104], %267 {strides = array<i32>} : memref<1x16x8xf32, #tpu.memory_space<vmem>>, vector<1x2x8xf32>,
    %268 = vector.extract_strided_slice %1 {offsets = [6, 0], sizes = [2, 8], strides = [1, 1]} : vector<16x8xf32> to vector<2x8xf32>
    %269 = vector.extract_strided_slice %3 {offsets = [6, 0], sizes = [2, 8], strides = [1, 1]} : vector<16x8xf32> to vector<2x8xf32>
    %270 = vector.extract_strided_slice %23 {offsets = [6, 0], sizes = [2, 32], strides = [1, 1]} : vector<16x32xf32> to vector<2x32xf32>
    %271 = vector.extract_strided_slice %47 {offsets = [6, 0], sizes = [2, 8], strides = [1, 1]} : vector<16x8xf32> to vector<2x8xf32>
    %272 = vector.extract_strided_slice %62 {offsets = [6, 0], sizes = [2, 128], strides = [1, 1]} : vector<16x128xf32> to vector<2x128xf32>
    %273 = vector.extract_strided_slice %11 {offsets = [3, 0], sizes = [1, 1], strides = [1, 1]} : vector<8x1xf32> to vector<1x1xf32>
    %274 = arith.mulf %252, %270 : vector<2x32xf32>
    %cst_105 = arith.constant dense<0.000000e+00> : vector<2x136xf32>
    %275 = tpu.matmul %274, %64, %cst_105 {dimension_numbers = #tpu.dot_dimension_numbers<[1], [0], [0], [1], [0, 0, 1, 1], [], []>} : vector<2x32xf32>, vector<32x136xf32>, vector<2x136xf32> -> vector<2x136xf32>
    %276 = vector.extract_strided_slice %275 {offsets = [0, 128], sizes = [2, 8], strides = [1, 1]} : vector<2x136xf32> to vector<2x8xf32>
    %277 = vector.broadcast %70 : vector<1x8xf32> to vector<2x8xf32>
    %278 = arith.addf %276, %277 : vector<2x8xf32>
    %279 = arith.mulf %269, %268 : vector<2x8xf32>
    %cst_106 = arith.constant 1.000000e+00 : f32
    %280 = vector.broadcast %cst_106 : f32 to vector<2x8xf32>
    %281 = arith.subf %280, %269 : vector<2x8xf32>
    %282 = arith.mulf %281, %278 : vector<2x8xf32>
    %283 = arith.addf %279, %282 : vector<2x8xf32>
    %cst_107 = arith.constant dense<0.000000e+00> : vector<2x8xf32>
    %284 = tpu.matmul %283, %68, %cst_107 {dimension_numbers = #tpu.dot_dimension_numbers<[1], [0], [0], [1], [0, 0, 1, 1], [], []>} : vector<2x8xf32>, vector<8x8xf32>, vector<2x8xf32> -> vector<2x8xf32>
    %285 = vector.broadcast %72 : vector<1x8xf32> to vector<2x8xf32>
    %286 = arith.addf %284, %285 : vector<2x8xf32>
    %287 = arith.mulf %271, %286 : vector<2x8xf32>
    %cst_108 = arith.constant 1.000000e+00 : f32
    %288 = vector.broadcast %cst_108 : f32 to vector<2x8xf32>
    %289 = arith.subf %288, %271 : vector<2x8xf32>
    %290 = arith.mulf %289, %278 : vector<2x8xf32>
    %291 = arith.addf %287, %290 : vector<2x8xf32>
    %292 = arith.mulf %269, %268 : vector<2x8xf32>
    %cst_109 = arith.constant 1.000000e+00 : f32
    %293 = vector.broadcast %cst_109 : f32 to vector<2x8xf32>
    %294 = arith.subf %293, %269 : vector<2x8xf32>
    %295 = arith.mulf %294, %291 : vector<2x8xf32>
    %296 = arith.addf %292, %295 : vector<2x8xf32>
    %297 = vector.extract_strided_slice %275 {offsets = [0, 0], sizes = [2, 128], strides = [1, 1]} : vector<2x136xf32> to vector<2x128xf32>
    %298 = arith.addf %272, %297 : vector<2x128xf32>
    %cst_110 = arith.constant dense<0.000000e+00> : vector<2x128xf32>
    %299 = tpu.matmul %296, %66, %cst_110 {dimension_numbers = #tpu.dot_dimension_numbers<[1], [0], [0], [1], [0, 0, 1, 1], [], []>} : vector<2x8xf32>, vector<8x128xf32>, vector<2x128xf32> -> vector<2x128xf32>
    %300 = arith.addf %298, %299 : vector<2x128xf32>
    %301 = vector.extract_strided_slice %300 {offsets = [0, 0], sizes = [2, 96], strides = [1, 1]} : vector<2x128xf32> to vector<2x96xf32>
    %302 = arith.negf %301 : vector<2x96xf32>
    %303 = math.exp %302 : vector<2x96xf32>
    %cst_111 = arith.constant 1.000000e+00 : f32
    %304 = vector.broadcast %cst_111 : f32 to vector<2x96xf32>
    %305 = arith.addf %304, %303 : vector<2x96xf32>
    %306 = arith.divf %304, %305 : vector<2x96xf32>
    %307 = vector.extract_strided_slice %300 {offsets = [0, 96], sizes = [2, 32], strides = [1, 1]} : vector<2x128xf32> to vector<2x32xf32>
    %308 = math.tanh %307 : vector<2x32xf32>
    %309 = vector.extract_strided_slice %306 {offsets = [0, 32], sizes = [2, 32], strides = [1, 1]} : vector<2x96xf32> to vector<2x32xf32>
    %310 = arith.mulf %309, %249 : vector<2x32xf32>
    %311 = vector.extract_strided_slice %306 {offsets = [0, 0], sizes = [2, 32], strides = [1, 1]} : vector<2x96xf32> to vector<2x32xf32>
    %312 = arith.mulf %311, %308 : vector<2x32xf32>
    %313 = arith.addf %310, %312 : vector<2x32xf32>
    %314 = vector.extract_strided_slice %306 {offsets = [0, 64], sizes = [2, 32], strides = [1, 1]} : vector<2x96xf32> to vector<2x32xf32>
    %315 = math.tanh %313 : vector<2x32xf32>
    %316 = arith.mulf %314, %315 : vector<2x32xf32>
    %317 = arith.subf %268, %278 : vector<2x8xf32>
    %318 = math.absf %317 : vector<2x8xf32>
    %319 = arith.subf %268, %286 : vector<2x8xf32>
    %320 = math.absf %319 : vector<2x8xf32>
    %321 = arith.addf %318, %320 : vector<2x8xf32>
    %322 = arith.subf %268, %291 : vector<2x8xf32>
    %323 = math.absf %322 : vector<2x8xf32>
    %324 = arith.addf %321, %323 : vector<2x8xf32>
    %325 = vector.broadcast %273 : vector<1x1xf32> to vector<2x8xf32>
    %326 = arith.mulf %269, %325 : vector<2x8xf32>
    %327 = arith.mulf %324, %326 : vector<2x8xf32>
    %328 = arith.addf %264, %327 : vector<2x8xf32>
    %c0_112 = arith.constant 0 : index
    %c6 = arith.constant 6 : index
    %c0_113 = arith.constant 0 : index
    %329 = vector.load %arg15[%c0_112, %c6, %c0_113] : memref<1x16x8xf32, #tpu.memory_space<vmem>>, vector<1x2x8xf32>
    %330 = vector.shape_cast %329 : vector<1x2x8xf32> to vector<2x8xf32>
    %331 = vector.shape_cast %296 : vector<2x8xf32> to vector<1x2x8xf32>
    tpu.vector_store %arg15[%c0_112, %c6, %c0_113], %331 {strides = array<i32>} : memref<1x16x8xf32, #tpu.memory_space<vmem>>, vector<1x2x8xf32>,
    %332 = vector.extract_strided_slice %1 {offsets = [8, 0], sizes = [2, 8], strides = [1, 1]} : vector<16x8xf32> to vector<2x8xf32>
    %333 = vector.extract_strided_slice %3 {offsets = [8, 0], sizes = [2, 8], strides = [1, 1]} : vector<16x8xf32> to vector<2x8xf32>
    %334 = vector.extract_strided_slice %23 {offsets = [8, 0], sizes = [2, 32], strides = [1, 1]} : vector<16x32xf32> to vector<2x32xf32>
    %335 = vector.extract_strided_slice %47 {offsets = [8, 0], sizes = [2, 8], strides = [1, 1]} : vector<16x8xf32> to vector<2x8xf32>
    %336 = vector.extract_strided_slice %62 {offsets = [8, 0], sizes = [2, 128], strides = [1, 1]} : vector<16x128xf32> to vector<2x128xf32>
    %337 = vector.extract_strided_slice %11 {offsets = [4, 0], sizes = [1, 1], strides = [1, 1]} : vector<8x1xf32> to vector<1x1xf32>
    %338 = arith.mulf %316, %334 : vector<2x32xf32>
    %cst_114 = arith.constant dense<0.000000e+00> : vector<2x136xf32>
    %339 = tpu.matmul %338, %64, %cst_114 {dimension_numbers = #tpu.dot_dimension_numbers<[1], [0], [0], [1], [0, 0, 1, 1], [], []>} : vector<2x32xf32>, vector<32x136xf32>, vector<2x136xf32> -> vector<2x136xf32>
    %340 = vector.extract_strided_slice %339 {offsets = [0, 128], sizes = [2, 8], strides = [1, 1]} : vector<2x136xf32> to vector<2x8xf32>
    %341 = vector.broadcast %70 : vector<1x8xf32> to vector<2x8xf32>
    %342 = arith.addf %340, %341 : vector<2x8xf32>
    %343 = arith.mulf %333, %332 : vector<2x8xf32>
    %cst_115 = arith.constant 1.000000e+00 : f32
    %344 = vector.broadcast %cst_115 : f32 to vector<2x8xf32>
    %345 = arith.subf %344, %333 : vector<2x8xf32>
    %346 = arith.mulf %345, %342 : vector<2x8xf32>
    %347 = arith.addf %343, %346 : vector<2x8xf32>
    %cst_116 = arith.constant dense<0.000000e+00> : vector<2x8xf32>
    %348 = tpu.matmul %347, %68, %cst_116 {dimension_numbers = #tpu.dot_dimension_numbers<[1], [0], [0], [1], [0, 0, 1, 1], [], []>} : vector<2x8xf32>, vector<8x8xf32>, vector<2x8xf32> -> vector<2x8xf32>
    %349 = vector.broadcast %72 : vector<1x8xf32> to vector<2x8xf32>
    %350 = arith.addf %348, %349 : vector<2x8xf32>
    %351 = arith.mulf %335, %350 : vector<2x8xf32>
    %cst_117 = arith.constant 1.000000e+00 : f32
    %352 = vector.broadcast %cst_117 : f32 to vector<2x8xf32>
    %353 = arith.subf %352, %335 : vector<2x8xf32>
    %354 = arith.mulf %353, %342 : vector<2x8xf32>
    %355 = arith.addf %351, %354 : vector<2x8xf32>
    %356 = arith.mulf %333, %332 : vector<2x8xf32>
    %cst_118 = arith.constant 1.000000e+00 : f32
    %357 = vector.broadcast %cst_118 : f32 to vector<2x8xf32>
    %358 = arith.subf %357, %333 : vector<2x8xf32>
    %359 = arith.mulf %358, %355 : vector<2x8xf32>
    %360 = arith.addf %356, %359 : vector<2x8xf32>
    %361 = vector.extract_strided_slice %339 {offsets = [0, 0], sizes = [2, 128], strides = [1, 1]} : vector<2x136xf32> to vector<2x128xf32>
    %362 = arith.addf %336, %361 : vector<2x128xf32>
    %cst_119 = arith.constant dense<0.000000e+00> : vector<2x128xf32>
    %363 = tpu.matmul %360, %66, %cst_119 {dimension_numbers = #tpu.dot_dimension_numbers<[1], [0], [0], [1], [0, 0, 1, 1], [], []>} : vector<2x8xf32>, vector<8x128xf32>, vector<2x128xf32> -> vector<2x128xf32>
    %364 = arith.addf %362, %363 : vector<2x128xf32>
    %365 = vector.extract_strided_slice %364 {offsets = [0, 0], sizes = [2, 96], strides = [1, 1]} : vector<2x128xf32> to vector<2x96xf32>
    %366 = arith.negf %365 : vector<2x96xf32>
    %367 = math.exp %366 : vector<2x96xf32>
    %cst_120 = arith.constant 1.000000e+00 : f32
    %368 = vector.broadcast %cst_120 : f32 to vector<2x96xf32>
    %369 = arith.addf %368, %367 : vector<2x96xf32>
    %370 = arith.divf %368, %369 : vector<2x96xf32>
    %371 = vector.extract_strided_slice %364 {offsets = [0, 96], sizes = [2, 32], strides = [1, 1]} : vector<2x128xf32> to vector<2x32xf32>
    %372 = math.tanh %371 : vector<2x32xf32>
    %373 = vector.extract_strided_slice %370 {offsets = [0, 32], sizes = [2, 32], strides = [1, 1]} : vector<2x96xf32> to vector<2x32xf32>
    %374 = arith.mulf %373, %313 : vector<2x32xf32>
    %375 = vector.extract_strided_slice %370 {offsets = [0, 0], sizes = [2, 32], strides = [1, 1]} : vector<2x96xf32> to vector<2x32xf32>
    %376 = arith.mulf %375, %372 : vector<2x32xf32>
    %377 = arith.addf %374, %376 : vector<2x32xf32>
    %378 = vector.extract_strided_slice %370 {offsets = [0, 64], sizes = [2, 32], strides = [1, 1]} : vector<2x96xf32> to vector<2x32xf32>
    %379 = math.tanh %377 : vector<2x32xf32>
    %380 = arith.mulf %378, %379 : vector<2x32xf32>
    %381 = arith.subf %332, %342 : vector<2x8xf32>
    %382 = math.absf %381 : vector<2x8xf32>
    %383 = arith.subf %332, %350 : vector<2x8xf32>
    %384 = math.absf %383 : vector<2x8xf32>
    %385 = arith.addf %382, %384 : vector<2x8xf32>
    %386 = arith.subf %332, %355 : vector<2x8xf32>
    %387 = math.absf %386 : vector<2x8xf32>
    %388 = arith.addf %385, %387 : vector<2x8xf32>
    %389 = vector.broadcast %337 : vector<1x1xf32> to vector<2x8xf32>
    %390 = arith.mulf %333, %389 : vector<2x8xf32>
    %391 = arith.mulf %388, %390 : vector<2x8xf32>
    %392 = arith.addf %328, %391 : vector<2x8xf32>
    %c0_121 = arith.constant 0 : index
    %c8_122 = arith.constant 8 : index
    %c0_123 = arith.constant 0 : index
    %393 = vector.load %arg15[%c0_121, %c8_122, %c0_123] : memref<1x16x8xf32, #tpu.memory_space<vmem>>, vector<1x2x8xf32>
    %394 = vector.shape_cast %393 : vector<1x2x8xf32> to vector<2x8xf32>
    %395 = vector.shape_cast %360 : vector<2x8xf32> to vector<1x2x8xf32>
    tpu.vector_store %arg15[%c0_121, %c8_122, %c0_123], %395 {strides = array<i32>} : memref<1x16x8xf32, #tpu.memory_space<vmem>>, vector<1x2x8xf32>,
    %396 = vector.extract_strided_slice %1 {offsets = [10, 0], sizes = [2, 8], strides = [1, 1]} : vector<16x8xf32> to vector<2x8xf32>
    %397 = vector.extract_strided_slice %3 {offsets = [10, 0], sizes = [2, 8], strides = [1, 1]} : vector<16x8xf32> to vector<2x8xf32>
    %398 = vector.extract_strided_slice %23 {offsets = [10, 0], sizes = [2, 32], strides = [1, 1]} : vector<16x32xf32> to vector<2x32xf32>
    %399 = vector.extract_strided_slice %47 {offsets = [10, 0], sizes = [2, 8], strides = [1, 1]} : vector<16x8xf32> to vector<2x8xf32>
    %400 = vector.extract_strided_slice %62 {offsets = [10, 0], sizes = [2, 128], strides = [1, 1]} : vector<16x128xf32> to vector<2x128xf32>
    %401 = vector.extract_strided_slice %11 {offsets = [5, 0], sizes = [1, 1], strides = [1, 1]} : vector<8x1xf32> to vector<1x1xf32>
    %402 = arith.mulf %380, %398 : vector<2x32xf32>
    %cst_124 = arith.constant dense<0.000000e+00> : vector<2x136xf32>
    %403 = tpu.matmul %402, %64, %cst_124 {dimension_numbers = #tpu.dot_dimension_numbers<[1], [0], [0], [1], [0, 0, 1, 1], [], []>} : vector<2x32xf32>, vector<32x136xf32>, vector<2x136xf32> -> vector<2x136xf32>
    %404 = vector.extract_strided_slice %403 {offsets = [0, 128], sizes = [2, 8], strides = [1, 1]} : vector<2x136xf32> to vector<2x8xf32>
    %405 = vector.broadcast %70 : vector<1x8xf32> to vector<2x8xf32>
    %406 = arith.addf %404, %405 : vector<2x8xf32>
    %407 = arith.mulf %397, %396 : vector<2x8xf32>
    %cst_125 = arith.constant 1.000000e+00 : f32
    %408 = vector.broadcast %cst_125 : f32 to vector<2x8xf32>
    %409 = arith.subf %408, %397 : vector<2x8xf32>
    %410 = arith.mulf %409, %406 : vector<2x8xf32>
    %411 = arith.addf %407, %410 : vector<2x8xf32>
    %cst_126 = arith.constant dense<0.000000e+00> : vector<2x8xf32>
    %412 = tpu.matmul %411, %68, %cst_126 {dimension_numbers = #tpu.dot_dimension_numbers<[1], [0], [0], [1], [0, 0, 1, 1], [], []>} : vector<2x8xf32>, vector<8x8xf32>, vector<2x8xf32> -> vector<2x8xf32>
    %413 = vector.broadcast %72 : vector<1x8xf32> to vector<2x8xf32>
    %414 = arith.addf %412, %413 : vector<2x8xf32>
    %415 = arith.mulf %399, %414 : vector<2x8xf32>
    %cst_127 = arith.constant 1.000000e+00 : f32
    %416 = vector.broadcast %cst_127 : f32 to vector<2x8xf32>
    %417 = arith.subf %416, %399 : vector<2x8xf32>
    %418 = arith.mulf %417, %406 : vector<2x8xf32>
    %419 = arith.addf %415, %418 : vector<2x8xf32>
    %420 = arith.mulf %397, %396 : vector<2x8xf32>
    %cst_128 = arith.constant 1.000000e+00 : f32
    %421 = vector.broadcast %cst_128 : f32 to vector<2x8xf32>
    %422 = arith.subf %421, %397 : vector<2x8xf32>
    %423 = arith.mulf %422, %419 : vector<2x8xf32>
    %424 = arith.addf %420, %423 : vector<2x8xf32>
    %425 = vector.extract_strided_slice %403 {offsets = [0, 0], sizes = [2, 128], strides = [1, 1]} : vector<2x136xf32> to vector<2x128xf32>
    %426 = arith.addf %400, %425 : vector<2x128xf32>
    %cst_129 = arith.constant dense<0.000000e+00> : vector<2x128xf32>
    %427 = tpu.matmul %424, %66, %cst_129 {dimension_numbers = #tpu.dot_dimension_numbers<[1], [0], [0], [1], [0, 0, 1, 1], [], []>} : vector<2x8xf32>, vector<8x128xf32>, vector<2x128xf32> -> vector<2x128xf32>
    %428 = arith.addf %426, %427 : vector<2x128xf32>
    %429 = vector.extract_strided_slice %428 {offsets = [0, 0], sizes = [2, 96], strides = [1, 1]} : vector<2x128xf32> to vector<2x96xf32>
    %430 = arith.negf %429 : vector<2x96xf32>
    %431 = math.exp %430 : vector<2x96xf32>
    %cst_130 = arith.constant 1.000000e+00 : f32
    %432 = vector.broadcast %cst_130 : f32 to vector<2x96xf32>
    %433 = arith.addf %432, %431 : vector<2x96xf32>
    %434 = arith.divf %432, %433 : vector<2x96xf32>
    %435 = vector.extract_strided_slice %428 {offsets = [0, 96], sizes = [2, 32], strides = [1, 1]} : vector<2x128xf32> to vector<2x32xf32>
    %436 = math.tanh %435 : vector<2x32xf32>
    %437 = vector.extract_strided_slice %434 {offsets = [0, 32], sizes = [2, 32], strides = [1, 1]} : vector<2x96xf32> to vector<2x32xf32>
    %438 = arith.mulf %437, %377 : vector<2x32xf32>
    %439 = vector.extract_strided_slice %434 {offsets = [0, 0], sizes = [2, 32], strides = [1, 1]} : vector<2x96xf32> to vector<2x32xf32>
    %440 = arith.mulf %439, %436 : vector<2x32xf32>
    %441 = arith.addf %438, %440 : vector<2x32xf32>
    %442 = vector.extract_strided_slice %434 {offsets = [0, 64], sizes = [2, 32], strides = [1, 1]} : vector<2x96xf32> to vector<2x32xf32>
    %443 = math.tanh %441 : vector<2x32xf32>
    %444 = arith.mulf %442, %443 : vector<2x32xf32>
    %445 = arith.subf %396, %406 : vector<2x8xf32>
    %446 = math.absf %445 : vector<2x8xf32>
    %447 = arith.subf %396, %414 : vector<2x8xf32>
    %448 = math.absf %447 : vector<2x8xf32>
    %449 = arith.addf %446, %448 : vector<2x8xf32>
    %450 = arith.subf %396, %419 : vector<2x8xf32>
    %451 = math.absf %450 : vector<2x8xf32>
    %452 = arith.addf %449, %451 : vector<2x8xf32>
    %453 = vector.broadcast %401 : vector<1x1xf32> to vector<2x8xf32>
    %454 = arith.mulf %397, %453 : vector<2x8xf32>
    %455 = arith.mulf %452, %454 : vector<2x8xf32>
    %456 = arith.addf %392, %455 : vector<2x8xf32>
    %c0_131 = arith.constant 0 : index
    %c10 = arith.constant 10 : index
    %c0_132 = arith.constant 0 : index
    %457 = vector.load %arg15[%c0_131, %c10, %c0_132] : memref<1x16x8xf32, #tpu.memory_space<vmem>>, vector<1x2x8xf32>
    %458 = vector.shape_cast %457 : vector<1x2x8xf32> to vector<2x8xf32>
    %459 = vector.shape_cast %424 : vector<2x8xf32> to vector<1x2x8xf32>
    tpu.vector_store %arg15[%c0_131, %c10, %c0_132], %459 {strides = array<i32>} : memref<1x16x8xf32, #tpu.memory_space<vmem>>, vector<1x2x8xf32>,
    %460 = vector.extract_strided_slice %1 {offsets = [12, 0], sizes = [2, 8], strides = [1, 1]} : vector<16x8xf32> to vector<2x8xf32>
    %461 = vector.extract_strided_slice %3 {offsets = [12, 0], sizes = [2, 8], strides = [1, 1]} : vector<16x8xf32> to vector<2x8xf32>
    %462 = vector.extract_strided_slice %23 {offsets = [12, 0], sizes = [2, 32], strides = [1, 1]} : vector<16x32xf32> to vector<2x32xf32>
    %463 = vector.extract_strided_slice %47 {offsets = [12, 0], sizes = [2, 8], strides = [1, 1]} : vector<16x8xf32> to vector<2x8xf32>
    %464 = vector.extract_strided_slice %62 {offsets = [12, 0], sizes = [2, 128], strides = [1, 1]} : vector<16x128xf32> to vector<2x128xf32>
    %465 = vector.extract_strided_slice %11 {offsets = [6, 0], sizes = [1, 1], strides = [1, 1]} : vector<8x1xf32> to vector<1x1xf32>
    %466 = arith.mulf %444, %462 : vector<2x32xf32>
    %cst_133 = arith.constant dense<0.000000e+00> : vector<2x136xf32>
    %467 = tpu.matmul %466, %64, %cst_133 {dimension_numbers = #tpu.dot_dimension_numbers<[1], [0], [0], [1], [0, 0, 1, 1], [], []>} : vector<2x32xf32>, vector<32x136xf32>, vector<2x136xf32> -> vector<2x136xf32>
    %468 = vector.extract_strided_slice %467 {offsets = [0, 128], sizes = [2, 8], strides = [1, 1]} : vector<2x136xf32> to vector<2x8xf32>
    %469 = vector.broadcast %70 : vector<1x8xf32> to vector<2x8xf32>
    %470 = arith.addf %468, %469 : vector<2x8xf32>
    %471 = arith.mulf %461, %460 : vector<2x8xf32>
    %cst_134 = arith.constant 1.000000e+00 : f32
    %472 = vector.broadcast %cst_134 : f32 to vector<2x8xf32>
    %473 = arith.subf %472, %461 : vector<2x8xf32>
    %474 = arith.mulf %473, %470 : vector<2x8xf32>
    %475 = arith.addf %471, %474 : vector<2x8xf32>
    %cst_135 = arith.constant dense<0.000000e+00> : vector<2x8xf32>
    %476 = tpu.matmul %475, %68, %cst_135 {dimension_numbers = #tpu.dot_dimension_numbers<[1], [0], [0], [1], [0, 0, 1, 1], [], []>} : vector<2x8xf32>, vector<8x8xf32>, vector<2x8xf32> -> vector<2x8xf32>
    %477 = vector.broadcast %72 : vector<1x8xf32> to vector<2x8xf32>
    %478 = arith.addf %476, %477 : vector<2x8xf32>
    %479 = arith.mulf %463, %478 : vector<2x8xf32>
    %cst_136 = arith.constant 1.000000e+00 : f32
    %480 = vector.broadcast %cst_136 : f32 to vector<2x8xf32>
    %481 = arith.subf %480, %463 : vector<2x8xf32>
    %482 = arith.mulf %481, %470 : vector<2x8xf32>
    %483 = arith.addf %479, %482 : vector<2x8xf32>
    %484 = arith.mulf %461, %460 : vector<2x8xf32>
    %cst_137 = arith.constant 1.000000e+00 : f32
    %485 = vector.broadcast %cst_137 : f32 to vector<2x8xf32>
    %486 = arith.subf %485, %461 : vector<2x8xf32>
    %487 = arith.mulf %486, %483 : vector<2x8xf32>
    %488 = arith.addf %484, %487 : vector<2x8xf32>
    %489 = vector.extract_strided_slice %467 {offsets = [0, 0], sizes = [2, 128], strides = [1, 1]} : vector<2x136xf32> to vector<2x128xf32>
    %490 = arith.addf %464, %489 : vector<2x128xf32>
    %cst_138 = arith.constant dense<0.000000e+00> : vector<2x128xf32>
    %491 = tpu.matmul %488, %66, %cst_138 {dimension_numbers = #tpu.dot_dimension_numbers<[1], [0], [0], [1], [0, 0, 1, 1], [], []>} : vector<2x8xf32>, vector<8x128xf32>, vector<2x128xf32> -> vector<2x128xf32>
    %492 = arith.addf %490, %491 : vector<2x128xf32>
    %493 = vector.extract_strided_slice %492 {offsets = [0, 0], sizes = [2, 96], strides = [1, 1]} : vector<2x128xf32> to vector<2x96xf32>
    %494 = arith.negf %493 : vector<2x96xf32>
    %495 = math.exp %494 : vector<2x96xf32>
    %cst_139 = arith.constant 1.000000e+00 : f32
    %496 = vector.broadcast %cst_139 : f32 to vector<2x96xf32>
    %497 = arith.addf %496, %495 : vector<2x96xf32>
    %498 = arith.divf %496, %497 : vector<2x96xf32>
    %499 = vector.extract_strided_slice %492 {offsets = [0, 96], sizes = [2, 32], strides = [1, 1]} : vector<2x128xf32> to vector<2x32xf32>
    %500 = math.tanh %499 : vector<2x32xf32>
    %501 = vector.extract_strided_slice %498 {offsets = [0, 32], sizes = [2, 32], strides = [1, 1]} : vector<2x96xf32> to vector<2x32xf32>
    %502 = arith.mulf %501, %441 : vector<2x32xf32>
    %503 = vector.extract_strided_slice %498 {offsets = [0, 0], sizes = [2, 32], strides = [1, 1]} : vector<2x96xf32> to vector<2x32xf32>
    %504 = arith.mulf %503, %500 : vector<2x32xf32>
    %505 = arith.addf %502, %504 : vector<2x32xf32>
    %506 = vector.extract_strided_slice %498 {offsets = [0, 64], sizes = [2, 32], strides = [1, 1]} : vector<2x96xf32> to vector<2x32xf32>
    %507 = math.tanh %505 : vector<2x32xf32>
    %508 = arith.mulf %506, %507 : vector<2x32xf32>
    %509 = arith.subf %460, %470 : vector<2x8xf32>
    %510 = math.absf %509 : vector<2x8xf32>
    %511 = arith.subf %460, %478 : vector<2x8xf32>
    %512 = math.absf %511 : vector<2x8xf32>
    %513 = arith.addf %510, %512 : vector<2x8xf32>
    %514 = arith.subf %460, %483 : vector<2x8xf32>
    %515 = math.absf %514 : vector<2x8xf32>
    %516 = arith.addf %513, %515 : vector<2x8xf32>
    %517 = vector.broadcast %465 : vector<1x1xf32> to vector<2x8xf32>
    %518 = arith.mulf %461, %517 : vector<2x8xf32>
    %519 = arith.mulf %516, %518 : vector<2x8xf32>
    %520 = arith.addf %456, %519 : vector<2x8xf32>
    %c0_140 = arith.constant 0 : index
    %c12 = arith.constant 12 : index
    %c0_141 = arith.constant 0 : index
    %521 = vector.load %arg15[%c0_140, %c12, %c0_141] : memref<1x16x8xf32, #tpu.memory_space<vmem>>, vector<1x2x8xf32>
    %522 = vector.shape_cast %521 : vector<1x2x8xf32> to vector<2x8xf32>
    %523 = vector.shape_cast %488 : vector<2x8xf32> to vector<1x2x8xf32>
    tpu.vector_store %arg15[%c0_140, %c12, %c0_141], %523 {strides = array<i32>} : memref<1x16x8xf32, #tpu.memory_space<vmem>>, vector<1x2x8xf32>,
    %524 = vector.extract_strided_slice %1 {offsets = [14, 0], sizes = [2, 8], strides = [1, 1]} : vector<16x8xf32> to vector<2x8xf32>
    %525 = vector.extract_strided_slice %3 {offsets = [14, 0], sizes = [2, 8], strides = [1, 1]} : vector<16x8xf32> to vector<2x8xf32>
    %526 = vector.extract_strided_slice %23 {offsets = [14, 0], sizes = [2, 32], strides = [1, 1]} : vector<16x32xf32> to vector<2x32xf32>
    %527 = vector.extract_strided_slice %47 {offsets = [14, 0], sizes = [2, 8], strides = [1, 1]} : vector<16x8xf32> to vector<2x8xf32>
    %528 = vector.extract_strided_slice %11 {offsets = [7, 0], sizes = [1, 1], strides = [1, 1]} : vector<8x1xf32> to vector<1x1xf32>
    %529 = arith.mulf %508, %526 : vector<2x32xf32>
    %cst_142 = arith.constant dense<0.000000e+00> : vector<2x136xf32>
    %530 = tpu.matmul %529, %64, %cst_142 {dimension_numbers = #tpu.dot_dimension_numbers<[1], [0], [0], [1], [0, 0, 1, 1], [], []>} : vector<2x32xf32>, vector<32x136xf32>, vector<2x136xf32> -> vector<2x136xf32>
    %531 = vector.extract_strided_slice %530 {offsets = [0, 128], sizes = [2, 8], strides = [1, 1]} : vector<2x136xf32> to vector<2x8xf32>
    %532 = vector.broadcast %70 : vector<1x8xf32> to vector<2x8xf32>
    %533 = arith.addf %531, %532 : vector<2x8xf32>
    %534 = arith.mulf %525, %524 : vector<2x8xf32>
    %cst_143 = arith.constant 1.000000e+00 : f32
    %535 = vector.broadcast %cst_143 : f32 to vector<2x8xf32>
    %536 = arith.subf %535, %525 : vector<2x8xf32>
    %537 = arith.mulf %536, %533 : vector<2x8xf32>
    %538 = arith.addf %534, %537 : vector<2x8xf32>
    %cst_144 = arith.constant dense<0.000000e+00> : vector<2x8xf32>
    %539 = tpu.matmul %538, %68, %cst_144 {dimension_numbers = #tpu.dot_dimension_numbers<[1], [0], [0], [1], [0, 0, 1, 1], [], []>} : vector<2x8xf32>, vector<8x8xf32>, vector<2x8xf32> -> vector<2x8xf32>
    %540 = vector.broadcast %72 : vector<1x8xf32> to vector<2x8xf32>
    %541 = arith.addf %539, %540 : vector<2x8xf32>
    %542 = arith.mulf %527, %541 : vector<2x8xf32>
    %cst_145 = arith.constant 1.000000e+00 : f32
    %543 = vector.broadcast %cst_145 : f32 to vector<2x8xf32>
    %544 = arith.subf %543, %527 : vector<2x8xf32>
    %545 = arith.mulf %544, %533 : vector<2x8xf32>
    %546 = arith.addf %542, %545 : vector<2x8xf32>
    %547 = arith.mulf %525, %524 : vector<2x8xf32>
    %cst_146 = arith.constant 1.000000e+00 : f32
    %548 = vector.broadcast %cst_146 : f32 to vector<2x8xf32>
    %549 = arith.subf %548, %525 : vector<2x8xf32>
    %550 = arith.mulf %549, %546 : vector<2x8xf32>
    %551 = arith.addf %547, %550 : vector<2x8xf32>
    %552 = arith.subf %524, %533 : vector<2x8xf32>
    %553 = math.absf %552 : vector<2x8xf32>
    %554 = arith.subf %524, %541 : vector<2x8xf32>
    %555 = math.absf %554 : vector<2x8xf32>
    %556 = arith.addf %553, %555 : vector<2x8xf32>
    %557 = arith.subf %524, %546 : vector<2x8xf32>
    %558 = math.absf %557 : vector<2x8xf32>
    %559 = arith.addf %556, %558 : vector<2x8xf32>
    %560 = vector.broadcast %528 : vector<1x1xf32> to vector<2x8xf32>
    %561 = arith.mulf %525, %560 : vector<2x8xf32>
    %562 = arith.mulf %559, %561 : vector<2x8xf32>
    %563 = arith.addf %520, %562 : vector<2x8xf32>
    %c0_147 = arith.constant 0 : index
    %c14 = arith.constant 14 : index
    %c0_148 = arith.constant 0 : index
    %564 = vector.load %arg15[%c0_147, %c14, %c0_148] : memref<1x16x8xf32, #tpu.memory_space<vmem>>, vector<1x2x8xf32>
    %565 = vector.shape_cast %564 : vector<1x2x8xf32> to vector<2x8xf32>
    %566 = vector.shape_cast %551 : vector<2x8xf32> to vector<1x2x8xf32>
    tpu.vector_store %arg15[%c0_147, %c14, %c0_148], %566 {strides = array<i32>} : memref<1x16x8xf32, #tpu.memory_space<vmem>>, vector<1x2x8xf32>,
    %cst_149 = arith.constant dense<0.000000e+00> : vector<2xf32>
    %567 = vector.multi_reduction <add>, %563, %cst_149 [1] : vector<2x8xf32> to vector<2xf32>
    %568 = vector.shape_cast %567 : vector<2xf32> to vector<2x1xf32>
    %cst_150 = arith.constant dense<0.000000e+00> : vector<1xf32>
    %569 = vector.multi_reduction <add>, %568, %cst_150 [0] : vector<2x1xf32> to vector<1xf32>
    %570 = vector.shape_cast %569 : vector<1xf32> to vector<1x1xf32>
    %c0_151 = arith.constant 0 : index
    %c0_152 = arith.constant 0 : index
    %c0_153 = arith.constant 0 : index
    %571 = vector.load %arg16[%c0_151, %c0_152, %c0_153] : memref<1x1x1xf32, #tpu.memory_space<vmem>>, vector<1x1x1xf32>
    %572 = vector.shape_cast %571 : vector<1x1x1xf32> to vector<1x1xf32>
    %573 = vector.shape_cast %570 : vector<1x1xf32> to vector<1x1x1xf32>
    tpu.vector_store %arg16[%c0_151, %c0_152, %c0_153], %573 {strides = array<i32>} : memref<1x1x1xf32, #tpu.memory_space<vmem>>, vector<1x1x1xf32>,
    return
  }
  func.func @transform_0(%arg0: i32) -> (i32, i32, i32, i32) {
    %c0_i32 = arith.constant 0 : i32
    %c0_i32_0 = arith.constant 0 : i32
    %c0_i32_1 = arith.constant 0 : i32
    %c0_i32_2 = arith.constant 0 : i32
    return %arg0, %c0_i32, %c0_i32_0, %c0_i32_1 : i32, i32, i32, i32
  }
  func.func @transform_1(%arg0: i32) -> (i32, i32, i32) {
    %c0_i32 = arith.constant 0 : i32
    %c0_i32_0 = arith.constant 0 : i32
    %c0_i32_1 = arith.constant 0 : i32
    return %arg0, %c0_i32, %c0_i32_0 : i32, i32, i32
  }
  func.func @transform_2(%arg0: i32) -> (i32, i32, i32) {
    %c0_i32 = arith.constant 0 : i32
    %c0_i32_0 = arith.constant 0 : i32
    %c0_i32_1 = arith.constant 0 : i32
    return %arg0, %c0_i32, %c0_i32_0 : i32, i32, i32
  }
  func.func @transform_3(%arg0: i32) -> (i32, i32, i32) {
    %c0_i32 = arith.constant 0 : i32
    %c0_i32_0 = arith.constant 0 : i32
    %c0_i32_1 = arith.constant 0 : i32
    return %arg0, %c0_i32, %c0_i32_0 : i32, i32, i32
  }
  func.func @transform_4(%arg0: i32) -> (i32, i32, i32) {
    %c0_i32 = arith.constant 0 : i32
    %c0_i32_0 = arith.constant 0 : i32
    %c0_i32_1 = arith.constant 0 : i32
    return %arg0, %c0_i32, %c0_i32_0 : i32, i32, i32
  }
  func.func @transform_5(%arg0: i32) -> (i32, i32, i32) {
    %c0_i32 = arith.constant 0 : i32
    %c0_i32_0 = arith.constant 0 : i32
    %c0_i32_1 = arith.constant 0 : i32
    return %arg0, %c0_i32, %c0_i32_0 : i32, i32, i32
  }
  func.func @transform_6(%arg0: i32) -> (i32, i32, i32) {
    %c0_i32 = arith.constant 0 : i32
    %c0_i32_0 = arith.constant 0 : i32
    %c0_i32_1 = arith.constant 0 : i32
    return %arg0, %c0_i32, %c0_i32_0 : i32, i32, i32
  }
  func.func @transform_7(%arg0: i32) -> (i32, i32, i32) {
    %c0_i32 = arith.constant 0 : i32
    %c0_i32_0 = arith.constant 0 : i32
    %c0_i32_1 = arith.constant 0 : i32
    return %arg0, %c0_i32, %c0_i32_0 : i32, i32, i32
  }
  func.func @transform_8(%arg0: i32) -> (i32, i32, i32) {
    %c0_i32 = arith.constant 0 : i32
    %c0_i32_0 = arith.constant 0 : i32
    %c0_i32_1 = arith.constant 0 : i32
    return %arg0, %c0_i32, %c0_i32_0 : i32, i32, i32
  }
  func.func @transform_9(%arg0: i32) -> (i32, i32, i32) {
    %c0_i32 = arith.constant 0 : i32
    %c0_i32_0 = arith.constant 0 : i32
    %c0_i32_1 = arith.constant 0 : i32
    return %arg0, %c0_i32, %c0_i32_0 : i32, i32, i32
  }
  func.func @transform_10(%arg0: i32) -> (i32, i32, i32) {
    %c0_i32 = arith.constant 0 : i32
    %c0_i32_0 = arith.constant 0 : i32
    %c0_i32_1 = arith.constant 0 : i32
    return %arg0, %c0_i32, %c0_i32_0 : i32, i32, i32
  }
  func.func @transform_11(%arg0: i32) -> (i32, i32, i32) {
    %c0_i32 = arith.constant 0 : i32
    %c0_i32_0 = arith.constant 0 : i32
    %c0_i32_1 = arith.constant 0 : i32
    return %arg0, %c0_i32, %c0_i32_0 : i32, i32, i32
  }
  func.func @transform_12(%arg0: i32) -> (i32, i32, i32) {
    %c0_i32 = arith.constant 0 : i32
    %c0_i32_0 = arith.constant 0 : i32
    %c0_i32_1 = arith.constant 0 : i32
    return %arg0, %c0_i32, %c0_i32_0 : i32, i32, i32
  }
  func.func @transform_13(%arg0: i32) -> (i32, i32, i32) {
    %c0_i32 = arith.constant 0 : i32
    %c0_i32_0 = arith.constant 0 : i32
    %c0_i32_1 = arith.constant 0 : i32
    return %arg0, %c0_i32, %c0_i32_0 : i32, i32, i32
  }
  func.func @transform_14(%arg0: i32) -> (i32, i32, i32) {
    %c0_i32 = arith.constant 0 : i32
    %c0_i32_0 = arith.constant 0 : i32
    %c0_i32_1 = arith.constant 0 : i32
    return %arg0, %c0_i32, %c0_i32_0 : i32, i32, i32
  }
  func.func @transform_15(%arg0: i32) -> (i32, i32, i32) {
    %c0_i32 = arith.constant 0 : i32
    %c0_i32_0 = arith.constant 0 : i32
    %c0_i32_1 = arith.constant 0 : i32
    return %arg0, %c0_i32, %c0_i32_0 : i32, i32, i32
  }
}

</mosaic_0001>

<bundles_post_ra>
// kernel: brits_forward.1
= control target key start
LH: loop header
LB: loop body
LE: loop exit
PB: predicated region body
PF: predicated region fallthrough
CT: control target
= control target key end

     0   :  { %s4243_s18 = smov 0   ;;  %s4782_s0 = inlined_call_operand.vmem [shape: f32[2,5,16,8], index: 0, kind: input, shape index: {}]   ;;  %s4783_s1 = inlined_call_operand.vmem [shape: f32[2,8,1], index: 1, kind: input, shape index: {}]   ;;  %s4784_s2 = inlined_call_operand.vmem [shape: f32[2,8,32], index: 2, kind: input, shape index: {}]   ;;  %s4785_s3 = inlined_call_operand.vmem [shape: f32[2,1,32], index: 3, kind: input, shape index: {}]   ;;  %s4786_s4 = inlined_call_operand.vmem [shape: f32[2,1,8], index: 4, kind: input, shape index: {}]   ;;  %s4787_s5 = inlined_call_operand.vmem [shape: f32[2,1,8], index: 5, kind: input, shape index: {}]   ;;  %s4788_s6 = inlined_call_operand.vmem [shape: f32[2,32,136], index: 6, kind: input, shape index: {}]   ;;  %s4789_s7 = inlined_call_operand.vmem [shape: f32[2,1,8], index: 7, kind: input, shape index: {}]   ;;  %s4790_s8 = inlined_call_operand.vmem [shape: f32[2,8,8], index: 8, kind: input, shape index: {}]   ;;  %s4791_s9 = inlined_call_operand.vmem [shape: f32[2,1,8], index: 9, kind: input, shape index: {}]   ;;  %s4792_s10 = inlined_call_operand.vmem [shape: f32[2,16,8], index: 10, kind: input, shape index: {}]   ;;  %s4793_s11 = inlined_call_operand.vmem [shape: f32[2,1,8], index: 11, kind: input, shape index: {}]   ;;  %s4794_s12 = inlined_call_operand.vmem [shape: f32[2,32,128], index: 12, kind: input, shape index: {}]   ;;  %s4795_s13 = inlined_call_operand.vmem [shape: f32[2,1,128], index: 13, kind: input, shape index: {}]   ;;  %s4796_s14 = inlined_call_operand.vmem [shape: f32[2,16,8], index: 14, kind: output, shape index: {0}]   ;;  %s4797_s15 = inlined_call_operand.vmem [shape: f32[2,1,1], index: 15, kind: output, shape index: {1}]  }
   0x1 LB: > { %s3749_s19 = sadd.s32 4294967295, %s4157_s18   ;;  %p3753_p0 = scmp.ge.s32.totalorder %s4157_s18, 1  ;;  %s4157_s18 = sphi %s4243_s18, %s26_s18  }
   0x2   : > { %p553_p1 = scmp.lt.s32.totalorder %s4157_s18, 3 }
   0x4   : > { %p554_p2 = pnand %p3753_p0, %p553_p1 }
   0x5   : > { %p652_p3 = scmp.lt.s32.totalorder (!%p554_p2), %s3749_s19, 1  ;;  %vm736_vm0 = vcmask (!%p554_p2), 64512   ;;  %v4159_v28 = vmov (!%p554_p2), 0.0   ;;  %vm1289_vm1 = vcmask (!%p554_p2), 261120   ;;  %vm4160_vm2 = vmmov (!%p554_p2), 0  }
   0x6   : > { %557 = sbr.rel (%p554_p2) target bundleno = 8943 (0x22ef), region = 76  ;;  %vm1574_vm3 = vcmask (!%p554_p2), 58368   ;;  %vm1873_vm4 = vcmask (!%p554_p2), 60418   ;;  %vm2168_vm5 = vcmask (!%p554_p2), 62468   ;;  %vm2463_vm6 = vcmask (!%p554_p2), 64518  }
   0x7   : > { %vm3524_vm7 = vcmask (!%p554_p2), 1041408   ;;  %vm3532_vm8 = vcmask (!%p554_p2), 0  }
   0xd   : > { %s4799_s19 = smov (!%p652_p3, %s3749_s19), 1 }
   0xe   : > { %s4254_s20 = sshll.u32 %s4799_s19, 3  ;;  %s4052_s21 = smul.u32 80, %s4799_s19 }
   0xf   : > { %s4261_s24 = scalar_lea.vmem %s4783_s1, %s4254_s20  ;;  %s664_s27 = scalar_lea.vmem %s4784_s2, %s4254_s20 }
  0x10   : > { %v4268_v0 = vld [vmem:[%s4261_s24] sm:$0xff]  ;;  %s4273_s30 = scalar_lea.vmem %s4782_s0, %s4052_s21  ;;  %s670_s22 = scalar_lea.vmem %s4786_s4, %s4799_s19 }
  0x11   : > { %v728_v1 = vld [vmem:[%s664_s27] sm:$0xff]  ;;  %s673_s26 = scalar_lea.vmem %s4787_s5, %s4799_s19  ;;  %4053 = vpush %v4268_v0  ;;  %v3769_v3 = vld [vmem:[%s4273_s30 + $0x28] sm:$0xff]  ;;  %s3826_s21 = sshll.u32 %s4799_s19, 4  ;;  %v4296_v8 = vld [vmem:[%s4273_s30 + $0x10] sm:$0xff] }
  0x12   : > { %3877 = vmatprep.subr.mxu0 %v728_v1  ;;  %v3768_v2 = vld [vmem:[%s4273_s30 + $0x20] sm:$0xff]  ;;  %s4293_s29 = scalar_lea.vmem %s4792_s10, %s3826_s21  ;;  %3884 = vmatprep.mubr.msk.f32.mxu1 %vm736_vm0, %v4296_v8  ;;  %v4303_v10 = vld [vmem:[%s4273_s30 + $0x18] sm:$0xff]  ;;  %s3827_s16 = sshll.u32 %s4799_s19, 5  ;;  %v3770_v21 = vld [vmem:[%s4273_s30 + $0x30] sm:$0xff] }
  0x13   : > { %3878 = vmatpush3.msra.mxu0 %v728_v1  ;;  %v3777_v4 = vld [vmem:[%s670_s22] ss:$0 sm:$0xff]  ;;  %3879 = vmatprep.mubr.msk.f32.mxu0 %vm736_vm0, %v3768_v2  ;;  %v853_v9 = vld [vmem:[%s4293_s29 + $0x8] sm:$0xff]  ;;  %s4312_s23 = scalar_lea.vmem %s4794_s12, %s3827_s16  ;;  %v3771_v22 = vld [vmem:[%s4273_s30 + $0x38] sm:$0xff]  ;;  %s3825_s25 = sshll.u32 %s4799_s19, 6  ;;  %v4405_v1 = vsub.f32 1.0, %v4296_v8 }
  0x14   : > { %v833_v5 = vmul.f32 %v3777_v4, %v3768_v2  ;;  %v834_v6 = vmul.f32 %v3777_v4, %v3769_v3  ;;  %v3778_v7 = vld [vmem:[%s673_s26] ss:$0 sm:$0xff]  ;;  %3880 = vmatmul.mubr.msk.f32.vlgmr.msra.gmra.mrb[0].mxu0 %vm736_vm0, %v3769_v3  ;;  %3882 = vmatprep.subr.mxu1 %v853_v9  ;;  %v1026_v20 = vld [vmem:[%s4312_s23 + $0x10] sm:$0xff]  ;;  %v1025_v25 = vld [vmem:[%s4312_s23 + $0x8] sm:$0xff]  ;;  %s678_s28 = scalar_lea.vmem %s4788_s6, %s3825_s25  ;;  %s4345_s17 = scalar_lea.vmem %s4790_s8, %s4254_s20 }
  0x15   : > { %3883 = vmatpush3.msra.mxu1 %v853_v9  ;;  %3892 = vmatprep.subr.mxu0 %v1026_v20  ;;  %v852_v24 = vld [vmem:[%s4293_s29] sm:$0xff]  ;;  %v1183_v26 = vld [vmem:[%s4312_s23 + $0x18] sm:$0xff]  ;;  %v1277_v29 = vld [vmem:[%s678_s28 + $0x8] sm:$0xff]  ;;  %s667_s25 = scalar_lea.vmem %s4785_s3, %s4799_s19  ;;  %s704_s20 = scalar_lea.vmem %s4795_s13, %s4799_s19 }
  0x16   : > { %v842_v11 = vadd.f32 %v3778_v7, %v833_v5  ;;  %v843_v12 = vadd.f32 %v3778_v7, %v834_v6  ;;  %3885 = vmatmul.mubr.msk.f32.vlgmr.msra.gmra.mrb[0].mxu1 %vm736_vm0, %v4303_v10  ;;  %3893 = vmatpush3.msra.mxu0 %v1026_v20  ;;  %v3772_v27 = vld [vmem:[%s4273_s30 + $0x40] sm:$0xff]  ;;  %v1279_v30 = vld [vmem:[%s678_s28 + $0x18] sm:$0xff]  ;;  %v1278_v33 = vld [vmem:[%s678_s28 + $0x10] sm:$0xff]  ;;  %s4396_s26 = scalar_lea.vmem %s4789_s7, %s4799_s19  ;;  %s4424_s29 = scalar_lea.vmem %s4791_s9, %s4799_s19 }
  0x17   : > { %3894 = vmatprep.mubr.msk.f32.mxu0 %vm736_vm0, %v3770_v21  ;;  %3887 = vmatprep.subr.mxu1 %v852_v24  ;;  %v1276_v31 = vld [vmem:[%s678_s28] sm:$0xff]  ;;  %v4333_v32 = vpack.c.bf16 %v1279_v30, %v1277_v29  ;;  %v1281_v34 = vld [vmem:[%s678_s28 + $0x28] sm:$0xff]  ;;  %v1283_v35 = vld [vmem:[%s678_s28 + $0x38] sm:$0xff]  ;;  %s4446_s22 = scalar_lea.vmem %s4796_s14, %s3826_s21  ;;  %s4161_s21 = smov 32  }
  0x18   : > { %v844_v13 = vmax.f32 %v842_v11, 0.0  ;;  %v845_v17 = vmax.f32 %v843_v12, 0.0  ;;  %3895 = vmatmul.mubr.msk.f32.vlgmr.msra.gmra.mrb[2].mxu0 %vm736_vm0, %v3771_v22  ;;  %3888 = vmatpush3.msra.mxu1 %v852_v24  ;;  %v4336_v36 = vpack.c.bf16 %v1278_v33, %v1276_v31  ;;  %v4338_v37 = vpack.c.bf16 %v1283_v35, %v1281_v34  ;;  %v1280_v38 = vld [vmem:[%s678_s28 + $0x20] sm:$0xff]  ;;  %v1282_v39 = vld [vmem:[%s678_s28 + $0x30] sm:$0xff]  ;;  %v3773_v41 = vld [vmem:[%s4273_s30 + $0x48] sm:$0xff]  ;;  %s696_s28 = scalar_lea.vmem %s4793_s11, %s4799_s19 }
  0x19   : > { %3899 = vmatprep.mubr.msk.f32.mxu0 %vm736_vm0, %v4296_v8  ;;  %3897 = vmatprep.subr.mxu0 %v1025_v25  ;;  %v4349_v40 = vpack.c.bf16 %v1282_v39, %v1280_v38  ;;  %v4354_v42 = vld [vmem:[%s4345_s17] sm:$0xff] }
  0x1a   : > { %v846_v14 = vsub.f32 0.0, %v844_v13  ;;  %v847_v18 = vsub.f32 0.0, %v845_v17  ;;  %3898 = vmatpush3.msra.mxu0 %v1025_v25  ;;  %3983 = vmatprep.subr.bf16.mxu1 %v4333_v32  ;;  %v3774_v43 = vld [vmem:[%s667_s25] ss:$0 sm:$0xff]  ;;  %s4162_s25 = smov 64  }
  0x1b   : > { %3902 = vmatprep.subr.mxu0 %v1183_v26  ;;  %v4370_v52 = vld [vmem:[%s4312_s23] sm:$0xff] }
  0x1c   : > { %v848_v15 = vmul.f32 1.442695, %v846_v14  ;;  %v850_v19 = vmul.f32 1.442695, %v847_v18  ;;  %v3783_v54 = vld [vmem:[%s696_s28] ss:$0 sm:$0xff] }
  0x1d   : > { %v3790_v59 = vld [vmem:[%s704_s20] ss:$0 sm:$0xff] }
  0x1e   : > { %4081 = vpow2.f32 %v848_v15  ;;  %v4399_v62 = vld [vmem:[%s4273_s30] sm:$0xff] }
  0x1f   : > { %4083 = vpow2.f32 %v850_v19  ;;  %v4402_v63 = vld [vmem:[%s4396_s26] ss:$0 sm:$0xff]  ;;  %v4409_v4 = vmul.f32 %v4296_v8, %v4399_v62 }
  0x20   : > { %3900 = vmatmul.mubr.msk.f32.vlgmr.msra.gmra.mrb[2].mxu0 %vm736_vm0, %v4303_v10  ;;  %v4429_v11 = vld [vmem:[%s4424_s29] ss:$0 sm:$0xff] }
  0x21   : > { %3903 = vmatpush3.msra.mxu0 %v1183_v26  ;;  %3904 = vmatprep.mubr.msk.f32.mxu0 %vm736_vm0, %v3772_v27 }
  0x22   : > { %3907 = vmatprep.subr.mxu0 %v4159_v28 }
  0x28   : > { %v4082_v16 = vpop.eup %4081  ;;  %3905 = vmatmul.mubr.msk.f32.vlgmr.msra.gmra.mrb[2].mxu0 %vm736_vm0, %v3773_v41 }
  0x29   : > { %3889 = vmatprep.mubr.msk.f32.mxu1 %vm736_vm0, %v4082_v16  ;;  %v4084_v23 = vpop.eup %4083  ;;  %3908 = vmatpush3.msra.mxu0 %v4354_v42 }
  0x2a   : > { %3890 = vmatmul.mubr.msk.f32.vlgmr.msra.gmra.mrb[0].mxu1 %vm736_vm0, %v4084_v23  ;;  %3991 = vmatprep.subr.bf16.mxu0 %v4333_v32 }
  0x2b   : > { %1357 = vmatprep.mubr.f32.mxu1 %v4159_v28  ;;  %3985 = vmatpush1.bf16.msra.mxu1 %v4336_v36 }
  0x2c   : > { %3987 = vmatprep.subr.bf16.mxu1 %v4338_v37  ;;  %3909 = vmatprep.mubr.msk.f32.mxu0 %vm4160_vm2, %v4159_v28 }
  0x2f   : > { %3989 = vmatpush1.bf16.msra.mxu1 %v4349_v40 }
  0x30   : > { %3912 = vmatprep.subr.mxu1 %v4159_v28 }
  0x42   : > { %s4054_s27 = spop %4053 }
  0xe7   : > { %v3881_v44 = vpop.f32.mrb[0].mxu0 }
  0xe8   : > { %v4365_v45 = vadd.f32 %v3881_v44, %v3774_v43  ;;  %v809_v46 = vpop.f32.mrb[1].mxu0 }
  0xe9   : > { %v810_v47 = vadd.f32 %v3774_v43, %v809_v46 }
  0xeb   : > { %v818_v48 = vmax.f32 %v810_v47, 0.0 }
  0xed   : > { %v820_v49 = vsub.f32 0.0, %v818_v48 }
  0xef   : > { %v822_v50 = vmul.f32 1.442695, %v820_v49 }
  0xf1   : > { %4085 = vpow2.f32 %v822_v50 }
  0xfb   : > { %v4367_v51 = vpop.eup %4085  ;;  %v3906_v58 = vpop.f32.mrb[2].mxu0 }
  0xfc   : > { %v1288_v53 = vmul.f32 0.0, %v4367_v51  ;;  %v4386_v60 = vadd.f32 %v3906_v58, %v3790_v59  ;;  %v1256_v61 = vpop.f32.mrb[3].mxu0 }
  0xfd   : > { %v3891_v55 = vpop.f32.mrb[0].mxu1  ;;  %v4458_v30 = vadd.f32 %v3790_v59, %v1256_v61 }
  0xfe   : > { %3791 = vmatmul.mubr.msk.f32.vlgmr.msra.gmra.mrb[2].mxu1 %vm1289_vm1, %v1288_v53  ;;  %v4380_v56 = vadd.f32 %v3891_v55, %v3783_v54  ;;  %v1007_v57 = vpop.f32.mrb[1].mxu1 }
  0xff   : > { %3913 = vmatpush3.msra.mxu1 %v4370_v52  ;;  %3914 = vmatprep.mubr.msk.f32.mxu1 %vm4160_vm2, %v4159_v28  ;;  %v4426_v9 = vadd.f32 %v3783_v54, %v1007_v57  ;;  %v1577_v54 = vrot.slane %v4367_v51, 2  ;;  %v1863_v51 = vrot.slane %v4268_v0, 1 }
 0x100   : > { %3917 = vmatprep.subr.mxu1 %v4159_v28 }
 0x101   : > { %v4432_v13 = vsub.f32 1.0, %v4426_v9  ;;  %4055 = vpush %v1863_v51 }
 0x132   : > { %s4056_s28 = spop %4055 }
 0x1d1   : > { %v1359_v2 = vpop.f32.mrb[2].mxu1 }
 0x1d2   : > { %v1361_v3 = vpop.f32.mrb[3].mxu1  ;;  %v1460_v31 = vadd.f32 %v1359_v2, %v4458_v30 }
 0x1d3   : > { %v1370_v5 = vadd.f32 %v4402_v63, %v1361_v3 }
 0x1d5   : > { %v1373_v6 = vmul.f32 %v4405_v1, %v1370_v5  ;;  %v1559_v14 = vsub.f32 %v4399_v62, %v1370_v5  ;;  %v1456_v17 = vmul.f32 %v4432_v13, %v1370_v5 }
 0x1d7   : > { %v1374_v7 = vadd.f32 %v1373_v6, %v4409_v4  ;;  %v1560_v20 = vand.u32 2147483647, %v1559_v14 }
 0x1d9   : > { %3910 = vmatmul.mubr.msk.f32.vlgmr.msra.gmra.mrb[4].mxu0 %vm736_vm0, %v1374_v7 }
 0x1da   : > { %3993 = vmatpush1.bf16.msra.mxu0 %v4336_v36  ;;  %1651 = vmatprep.mubr.f32.mxu0 %v4159_v28 }
 0x1db   : > { %3995 = vmatprep.subr.bf16.mxu0 %v4338_v37 }
 0x1de   : > { %3997 = vmatpush1.bf16.msra.mxu0 %v4349_v40 }
 0x1df   : > { %3999 = vmatprep.subr.bf16.mxu0 %v4333_v32 }
 0x2ac   : > { %v1450_v12 = vpop.f32.mrb[4].mxu0 }
 0x2ad   : > { %v1451_v15 = vadd.f32 %v4429_v11, %v1450_v12  ;;  %v3911_v16 = vpop.f32.mrb[5].mxu0 }
 0x2af   : > { %v1454_v18 = vmul.f32 %v1451_v15, %v4426_v9  ;;  %v1561_v19 = vsub.f32 %v4399_v62, %v1451_v15 }
 0x2b1   : > { %v1457_v21 = vadd.f32 %v1456_v17, %v1454_v18  ;;  %v1562_v22 = vand.u32 2147483647, %v1561_v19 }
 0x2b3   : > { %v1458_v23 = vmul.f32 %v1457_v21, %v4405_v1  ;;  %v1563_v24 = vadd.f32 %v1562_v22, %v1560_v20  ;;  %v1564_v25 = vsub.f32 %v4399_v62, %v1457_v21 }
 0x2b5   : > { %v1459_v26 = vadd.f32 %v1458_v23, %v4409_v4  ;;  %v1565_v27 = vand.u32 2147483647, %v1564_v25 }
 0x2b7   : > { %v4449_v29 = vadd.f32 %v1565_v27, %v1563_v24  ;;  %3915 = vmatmul.mubr.msk.f32.vlgmr.msra.gmra.mrb[4].mxu1 %vm736_vm0, %v1459_v26  ;;  %1575 = vst.msk [vmem:[%s4446_s22] sm:$0x3] %vm1574_vm3, %v1459_v26  ;;  %v1865_v26 = vstv %s4056_s28 }
 0x2b8   : > { %3918 = vmatpush3.msra.mxu1 %v4354_v42  ;;  %3919 = vmatprep.mubr.msk.f32.mxu1 %vm4160_vm2, %v4159_v28 }
 0x2b9   : > { %3922 = vmatprep.subr.mxu1 %v4159_v28 }
 0x38a   : > { %v1530_v33 = vpop.f32.mrb[4].mxu1 }
 0x38b   : > { %v1534_v34 = vadd.f32 %v1530_v33, %v1460_v31  ;;  %v3916_v35 = vpop.f32.mrb[5].mxu1 }
 0x38d   : > { %4087 = vtanh.f32 %v1534_v34  ;;  %v3796_v39 = vmul.f32 -1.442695, %v1534_v34  ;;  %v1569_v34 = vstv %s4054_s27 }
 0x38f   : > { %4089 = vpow2.f32 %v3796_v39  ;;  %v1867_v39 = vmul.f32 %v4296_v8, %v1865_v26 }
 0x397   : > { %v4088_v38 = vpop.eup %4087 }
 0x398   : > { %1544 = vrot.lane.b32.xlu0 %v4088_v38, %s4161_s21 }
 0x399   : > { %v4090_v41 = vpop.eup %4089 }
 0x39a   : > { %v1538_v43 = vadd.f32 1.0, %v4090_v41  ;;  %v1571_v41 = vmul.f32 %v4296_v8, %v1569_v34 }
 0x39c   : > { %4091 = vrcp.f32 %v1538_v43 }
 0x3a6   : > { %v4092_v44 = vpop.eup %4091 }
 0x3a7   : > { %v1542_v48 = vmul.f32 0.0, %v4092_v44 }
 0x40a   : > { %v1545_v46 = vpop.permute.xlu0 %1544 }
 0x40b   : > { %v1547_v47 = vmul.f32 %v4092_v44, %v1545_v46 }
 0x40d   : > { %1549 = vrot.lane.b32.xlu0 %v1547_v47, %s4161_s21  ;;  %v1572_v47 = vmul.f32 %v1571_v41, %v4449_v29 }
 0x47f   : > { %v1550_v49 = vpop.permute.xlu0 %1549 }
 0x480   : > { %v4463_v50 = vadd.f32 %v1550_v49, %v1542_v48 }
 0x482   : > { %4093 = vtanh.f32 %v4463_v50 }
 0x48c   : > { %v4094_v53 = vpop.eup %4093 }
 0x48d   : > { %1555 = vrot.lane.b32.xlu1 %v4094_v53, %s4161_s21 }
 0x491   : > { %1578 = vrot.lane.b32.xlu1 %v1577_v54, %s4162_s25 }
 0x4ff   : > { %v1556_v55 = vpop.permute.xlu1 %1555 }
 0x500   : > { %v1558_v57 = vmul.f32 %v4092_v44, %v1556_v55 }
 0x503   : > { %v4469_v58 = vpop.permute.xlu1 %1578 }
 0x504   : > { %v1581_v59 = vmul.f32 %v4469_v58, %v1558_v57 }
 0x506   : > { %1583 = vrot.lane.b32.xlu0 %v1581_v59, %s4162_s25 }
 0x578   : > { %v1584_v61 = vpop.permute.xlu0 %1583 }
 0x579   : > { %3797 = vmatmul.mubr.msk.f32.vlgmr.msra.gmra.mrb[6].mxu0 %vm1289_vm1, %v1584_v61 }
 0x57a   : > { %4001 = vmatpush1.bf16.msra.mxu0 %v4336_v36  ;;  %1946 = vmatprep.mubr.f32.mxu0 %v4159_v28 }
 0x57b   : > { %4003 = vmatprep.subr.bf16.mxu0 %v4338_v37 }
 0x57e   : > { %4005 = vmatpush1.bf16.msra.mxu0 %v4349_v40 }
 0x57f   : > { %4007 = vmatprep.subr.bf16.mxu0 %v4333_v32 }
 0x64c   : > { %v1653_v2 = vpop.f32.mrb[6].mxu0 }
 0x64d   : > { %v1655_v3 = vpop.f32.mrb[7].mxu0  ;;  %v1747_v53 = vrot.slane %v1653_v2, 6  ;;  %v1836_v2 = vrot.slane %v4463_v50, 6  ;;  %v2158_v50 = vrot.slane %v4268_v0, 2 }
 0x64e   : > { %v1658_v5 = vadd.f32 %v4402_v63, %v1655_v3 }
 0x64f   : > { %v1749_v55 = vadd.f32 %v1747_v53, %v4458_v30  ;;  %4057 = vpush %v2158_v50 }
 0x650   : > { %v1660_v6 = vrot.slane %v1658_v5, 6 }
 0x652   : > { %v1662_v7 = vmul.f32 %v1660_v6, %v4405_v1  ;;  %v1855_v18 = vsub.f32 %v4399_v62, %v1660_v6  ;;  %v1742_v20 = vmul.f32 %v1660_v6, %v4432_v13 }
 0x654   : > { %v1663_v12 = vadd.f32 %v1662_v7, %v4409_v4  ;;  %v1856_v23 = vand.u32 2147483647, %v1855_v18 }
 0x656   : > { %v1665_v14 = vrot.slane %v1663_v12, 2 }
 0x658   : > { %3920 = vmatmul.mubr.msk.f32.vlgmr.msra.gmra.mrb[6].mxu1 %vm736_vm0, %v1665_v14 }
 0x659   : > { %3923 = vmatpush3.msra.mxu1 %v4370_v52  ;;  %3924 = vmatprep.mubr.msk.f32.mxu1 %vm4160_vm2, %v4159_v28 }
 0x65a   : > { %3927 = vmatprep.subr.mxu1 %v4159_v28 }
 0x680   : > { %s4058_s16 = spop %4057 }
 0x72b   : > { %v1734_v15 = vpop.f32.mrb[6].mxu1 }
 0x72c   : > { %v1735_v16 = vadd.f32 %v4429_v11, %v1734_v15  ;;  %v3921_v17 = vpop.f32.mrb[7].mxu1 }
 0x72e   : > { %v1739_v19 = vrot.slane %v1735_v16, 6 }
 0x730   : > { %v1741_v21 = vmul.f32 %v1739_v19, %v4426_v9  ;;  %v1857_v22 = vsub.f32 %v4399_v62, %v1739_v19 }
 0x732   : > { %v1743_v24 = vadd.f32 %v1742_v20, %v1741_v21  ;;  %v1858_v25 = vand.u32 2147483647, %v1857_v22 }
 0x734   : > { %v1744_v27 = vmul.f32 %v1743_v24, %v4405_v1  ;;  %v1859_v31 = vadd.f32 %v1858_v25, %v1856_v23  ;;  %v1860_v33 = vsub.f32 %v4399_v62, %v1743_v24 }
 0x736   : > { %v1745_v35 = vadd.f32 %v1744_v27, %v4409_v4  ;;  %v1861_v38 = vand.u32 2147483647, %v1860_v33 }
 0x738   : > { %v1751_v43 = vrot.slane %v1745_v35, 2  ;;  %1874 = vst.msk [vmem:[%s4446_s22] sm:$0xc] %vm1873_vm4, %v1745_v35  ;;  %v1862_v44 = vadd.f32 %v1861_v38, %v1859_v31 }
 0x73a   : > { %v1868_v46 = vmul.f32 %v1867_v39, %v1862_v44  ;;  %3925 = vmatmul.mubr.msk.f32.vlgmr.msra.gmra.mrb[8].mxu1 %vm736_vm0, %v1751_v43 }
 0x73b   : > { %3928 = vmatpush3.msra.mxu1 %v4354_v42  ;;  %3929 = vmatprep.mubr.msk.f32.mxu1 %vm4160_vm2, %v4159_v28 }
 0x73c   : > { %v1870_v48 = vrot.slane %v1868_v46, 2  ;;  %3932 = vmatprep.subr.mxu1 %v4159_v28 }
 0x73e   : > { %v4506_v49 = vadd.f32 %v1870_v48, %v1572_v47 }
 0x80d   : > { %v1820_v54 = vpop.f32.mrb[8].mxu1 }
 0x80e   : > { %v1825_v57 = vrot.slane %v1820_v54, 6  ;;  %v3926_v59 = vpop.f32.mrb[9].mxu1  ;;  %v2160_v54 = vstv %s4058_s16 }
 0x810   : > { %v1827_v61 = vadd.f32 %v1825_v57, %v1749_v55 }
 0x812   : > { %4095 = vtanh.f32 %v1827_v61  ;;  %v3800_v3 = vmul.f32 -1.442695, %v1827_v61 }
 0x814   : > { %4097 = vpow2.f32 %v3800_v3  ;;  %v2162_v3 = vmul.f32 %v4296_v8, %v2160_v54 }
 0x81c   : > { %v4096_v51 = vpop.eup %4095 }
 0x81d   : > { %1840 = vrot.lane.b32.xlu1 %v4096_v51, %s4161_s21 }
 0x81e   : > { %v4098_v5 = vpop.eup %4097 }
 0x81f   : > { %v1831_v29 = vadd.f32 1.0, %v4098_v5 }
 0x821   : > { %4099 = vrcp.f32 %v1831_v29 }
 0x82b   : > { %v4100_v6 = vpop.eup %4099 }
 0x82c   : > { %v1838_v14 = vmul.f32 %v4100_v6, %v1836_v2 }
 0x88f   : > { %v1841_v7 = vpop.permute.xlu1 %1840 }
 0x890   : > { %v1843_v12 = vmul.f32 %v4100_v6, %v1841_v7 }
 0x892   : > { %1845 = vrot.lane.b32.xlu0 %v1843_v12, %s4161_s21 }
 0x904   : > { %v1846_v15 = vpop.permute.xlu0 %1845 }
 0x905   : > { %v4512_v16 = vadd.f32 %v1846_v15, %v1838_v14 }
 0x907   : > { %4101 = vtanh.f32 %v4512_v16 }
 0x911   : > { %v4102_v17 = vpop.eup %4101 }
 0x912   : > { %1851 = vrot.lane.b32.xlu1 %v4102_v17, %s4161_s21 }
 0x984   : > { %v1852_v18 = vpop.permute.xlu1 %1851 }
 0x985   : > { %v1854_v19 = vmul.f32 %v4100_v6, %v1852_v18 }
 0x987   : > { %v1875_v20 = vmul.f32 %v1854_v19, %v4469_v58 }
 0x989   : > { %v1877_v21 = vrot.slane %v1875_v20, 2 }
 0x98b   : > { %1878 = vrot.lane.b32.xlu0 %v1877_v21, %s4162_s25 }
 0x9fd   : > { %v1879_v22 = vpop.permute.xlu0 %1878 }
 0x9fe   : > { %3801 = vmatmul.mubr.msk.f32.vlgmr.msra.gmra.mrb[8].mxu0 %vm1289_vm1, %v1879_v22 }
 0x9ff   : > { %4009 = vmatpush1.bf16.msra.mxu0 %v4336_v36  ;;  %2241 = vmatprep.mubr.f32.mxu0 %v4159_v28 }
 0xa00   : > { %4011 = vmatprep.subr.bf16.mxu0 %v4338_v37 }
 0xa03   : > { %4013 = vmatpush1.bf16.msra.mxu0 %v4349_v40 }
 0xa04   : > { %4015 = vmatprep.subr.bf16.mxu0 %v4333_v32 }
 0xad1   : > { %v1948_v23 = vpop.f32.mrb[8].mxu0 }
 0xad2   : > { %v1950_v24 = vpop.f32.mrb[9].mxu0  ;;  %v2042_v2 = vrot.slane %v1948_v23, 4  ;;  %v2131_v23 = vrot.slane %v4512_v16, 6  ;;  %v2453_v16 = vrot.slane %v4268_v0, 3 }
 0xad3   : > { %v1953_v25 = vadd.f32 %v4402_v63, %v1950_v24 }
 0xad4   : > { %v2044_v15 = vadd.f32 %v2042_v2, %v4458_v30  ;;  %4059 = vpush %v2453_v16 }
 0xad5   : > { %v1955_v26 = vrot.slane %v1953_v25, 4 }
 0xad7   : > { %v1957_v27 = vmul.f32 %v1955_v26, %v4405_v1  ;;  %v2150_v39 = vsub.f32 %v4399_v62, %v1955_v26  ;;  %v2037_v43 = vmul.f32 %v1955_v26, %v4432_v13 }
 0xad9   : > { %v1958_v31 = vadd.f32 %v1957_v27, %v4409_v4  ;;  %v2151_v47 = vand.u32 2147483647, %v2150_v39 }
 0xadb   : > { %v1960_v33 = vrot.slane %v1958_v31, 4 }
 0xadd   : > { %3930 = vmatmul.mubr.msk.f32.vlgmr.msra.gmra.mrb[10].mxu1 %vm736_vm0, %v1960_v33 }
 0xade   : > { %3933 = vmatpush3.msra.mxu1 %v4370_v52  ;;  %3934 = vmatprep.mubr.msk.f32.mxu1 %vm4160_vm2, %v4159_v28 }
 0xadf   : > { %3937 = vmatprep.subr.mxu1 %v4159_v28 }
 0xb05   : > { %s4060_s20 = spop %4059 }
 0xb06   : > { %v2455_v2 = vstv %s4060_s20 }
 0xbb0   : > { %v2029_v34 = vpop.f32.mrb[10].mxu1 }
 0xbb1   : > { %v2030_v35 = vadd.f32 %v4429_v11, %v2029_v34  ;;  %v3931_v38 = vpop.f32.mrb[11].mxu1 }
 0xbb3   : > { %v2034_v41 = vrot.slane %v2030_v35, 4 }
 0xbb5   : > { %v2036_v44 = vmul.f32 %v2034_v41, %v4426_v9  ;;  %v2152_v46 = vsub.f32 %v4399_v62, %v2034_v41 }
 0xbb7   : > { %v2038_v48 = vadd.f32 %v2037_v43, %v2036_v44  ;;  %v2153_v53 = vand.u32 2147483647, %v2152_v46 }
 0xbb9   : > { %v2039_v55 = vmul.f32 %v2038_v48, %v4405_v1  ;;  %v2154_v57 = vadd.f32 %v2153_v53, %v2151_v47  ;;  %v2155_v59 = vsub.f32 %v4399_v62, %v2038_v48 }
 0xbbb   : > { %v2040_v61 = vadd.f32 %v2039_v55, %v4409_v4  ;;  %v2156_v51 = vand.u32 2147483647, %v2155_v59 }
 0xbbd   : > { %v2046_v5 = vrot.slane %v2040_v61, 4  ;;  %2169 = vst.msk [vmem:[%s4446_s22] sm:$0x30] %vm2168_vm5, %v2040_v61  ;;  %v2157_v29 = vadd.f32 %v2156_v51, %v2154_v57 }
 0xbbf   : > { %v2163_v6 = vmul.f32 %v2162_v3, %v2157_v29  ;;  %3935 = vmatmul.mubr.msk.f32.vlgmr.msra.gmra.mrb[12].mxu1 %vm736_vm0, %v2046_v5 }
 0xbc0   : > { %3938 = vmatpush3.msra.mxu1 %v4354_v42  ;;  %3939 = vmatprep.mubr.msk.f32.mxu1 %vm4160_vm2, %v4159_v28 }
 0xbc1   : > { %v2165_v7 = vrot.slane %v2163_v6, 4  ;;  %3942 = vmatprep.subr.mxu1 %v4159_v28 }
 0xbc3   : > { %v4550_v12 = vadd.f32 %v2165_v7, %v4506_v49 }
 0xc92   : > { %v2115_v14 = vpop.f32.mrb[12].mxu1 }
 0xc93   : > { %v2120_v17 = vrot.slane %v2115_v14, 4  ;;  %v3936_v18 = vpop.f32.mrb[13].mxu1 }
 0xc95   : > { %v2122_v19 = vadd.f32 %v2120_v17, %v2044_v15 }
 0xc97   : > { %4103 = vtanh.f32 %v2122_v19  ;;  %v3804_v21 = vmul.f32 -1.442695, %v2122_v19 }
 0xc99   : > { %4105 = vpow2.f32 %v3804_v21 }
 0xca1   : > { %v4104_v20 = vpop.eup %4103 }
 0xca2   : > { %2135 = vrot.lane.b32.xlu1 %v4104_v20, %s4161_s21 }
 0xca3   : > { %v4106_v22 = vpop.eup %4105 }
 0xca4   : > { %v2126_v50 = vadd.f32 1.0, %v4106_v22 }
 0xca6   : > { %4107 = vrcp.f32 %v2126_v50 }
 0xcb0   : > { %v4108_v24 = vpop.eup %4107 }
 0xcb1   : > { %v2133_v26 = vmul.f32 %v4108_v24, %v2131_v23 }
 0xd14   : > { %v2136_v25 = vpop.permute.xlu1 %2135 }
 0xd15   : > { %v2138_v49 = vmul.f32 %v4108_v24, %v2136_v25 }
 0xd17   : > { %2140 = vrot.lane.b32.xlu0 %v2138_v49, %s4161_s21 }
 0xd89   : > { %v2141_v27 = vpop.permute.xlu0 %2140 }
 0xd8a   : > { %v4556_v31 = vadd.f32 %v2141_v27, %v2133_v26  ;;  %v819_v26 = vmax.f32 %v4365_v45, 0.0 }
 0xd8c   : > { %4109 = vtanh.f32 %v4556_v31  ;;  %v2426_v16 = vrot.slane %v4556_v31, 6 }
 0xd96   : > { %v4110_v33 = vpop.eup %4109 }
 0xd97   : > { %2146 = vrot.lane.b32.xlu1 %v4110_v33, %s4161_s21  ;;  %v821_v33 = vsub.f32 0.0, %v819_v26 }
 0xe09   : > { %v2147_v34 = vpop.permute.xlu1 %2146 }
 0xe0a   : > { %v2149_v35 = vmul.f32 %v4108_v24, %v2147_v34 }
 0xe0c   : > { %v2170_v38 = vmul.f32 %v2149_v35, %v4469_v58 }
 0xe0e   : > { %v2172_v39 = vrot.slane %v2170_v38, 4 }
 0xe10   : > { %2173 = vrot.lane.b32.xlu0 %v2172_v39, %s4162_s25 }
 0xe82   : > { %v2174_v41 = vpop.permute.xlu0 %2173 }
 0xe83   : > { %3805 = vmatmul.mubr.msk.f32.vlgmr.msra.gmra.mrb[10].mxu0 %vm1289_vm1, %v2174_v41 }
 0xe84   : > { %4017 = vmatpush1.bf16.msra.mxu0 %v4336_v36  ;;  %2541 = vmatprep.mubr.f32.mxu0 %v4159_v28 }
 0xe85   : > { %4019 = vmatprep.subr.bf16.mxu0 %v4338_v37 }
 0xe88   : > { %4021 = vmatpush1.bf16.msra.mxu0 %v4349_v40 }
 0xe89   : > { %4023 = vmatprep.subr.bf16.mxu0 %v4333_v32 }
 0xf56   : > { %v2243_v58 = vpop.f32.mrb[10].mxu0 }
 0xf57   : > { %v2245_v43 = vpop.f32.mrb[11].mxu0 }
 0xf58   : > { %v2248_v44 = vadd.f32 %v4402_v63, %v2245_v43 }
 0xf5a   : > { %v2250_v46 = vrot.slane %v2248_v44, 2 }
 0xf5c   : > { %v2252_v47 = vmul.f32 %v2250_v46, %v4405_v1  ;;  %v2445_v59 = vsub.f32 %v4399_v62, %v2250_v46  ;;  %v2332_v51 = vmul.f32 %v2250_v46, %v4432_v13  ;;  %v2457_v13 = vmul.f32 %v4296_v8, %v2455_v2 }
 0xf5e   : > { %v2253_v48 = vadd.f32 %v2252_v47, %v4409_v4  ;;  %v2446_v29 = vand.u32 2147483647, %v2445_v59  ;;  %v4621_v59 = vsub.f32 1.0, %v4303_v10 }
 0xf60   : > { %v2255_v53 = vrot.slane %v2253_v48, 6 }
 0xf62   : > { %3940 = vmatmul.mubr.msk.f32.vlgmr.msra.gmra.mrb[14].mxu1 %vm736_vm0, %v2255_v53 }
 0xf63   : > { %3943 = vmatpush3.msra.mxu1 %v4370_v52  ;;  %3944 = vmatprep.mubr.msk.f32.mxu1 %vm4160_vm2, %v4159_v28 }
 0xf64   : > { %3947 = vmatprep.subr.mxu1 %v4159_v28 }
0x1035   : > { %v2324_v54 = vpop.f32.mrb[14].mxu1 }
0x1036   : > { %v2325_v55 = vadd.f32 %v4429_v11, %v2324_v54  ;;  %v3941_v57 = vpop.f32.mrb[15].mxu1 }
0x1037   : > { %v4618_v57 = vld [vmem:[%s4273_s30 + $0x8] sm:$0xff] }
0x1038   : > { %v2329_v61 = vrot.slane %v2325_v55, 2  ;;  %v2742_v55 = vrot.slane %v4268_v0, 4 }
0x103a   : > { %v2331_v3 = vmul.f32 %v2329_v61, %v4426_v9  ;;  %v2447_v5 = vsub.f32 %v4399_v62, %v2329_v61  ;;  %4061 = vpush %v2742_v55 }
0x103c   : > { %v2333_v6 = vadd.f32 %v2332_v51, %v2331_v3  ;;  %v2448_v7 = vand.u32 2147483647, %v2447_v5  ;;  %v4625_v3 = vmul.f32 %v4303_v10, %v4618_v57 }
0x103e   : > { %v2334_v14 = vmul.f32 %v2333_v6, %v4405_v1  ;;  %v2449_v15 = vadd.f32 %v2448_v7, %v2446_v29  ;;  %v2450_v17 = vsub.f32 %v4399_v62, %v2333_v6  ;;  %v4636_v7 = vsub.f32 1.0, %v4380_v56 }
0x1040   : > { %v2335_v18 = vadd.f32 %v2334_v14, %v4409_v4  ;;  %v2451_v19 = vand.u32 2147483647, %v2450_v17  ;;  %v2337_v4 = vrot.slane %v2243_v58, 2 }
0x1042   : > { %v2341_v20 = vrot.slane %v2335_v18, 6  ;;  %2464 = vst.msk [vmem:[%s4446_s22] sm:$0xc0] %vm2463_vm6, %v2335_v18  ;;  %v2452_v9 = vadd.f32 %v2451_v19, %v2449_v15  ;;  %v2339_v22 = vadd.f32 %v2337_v4, %v4458_v30 }
0x1044   : > { %v2458_v21 = vmul.f32 %v2457_v13, %v2452_v9  ;;  %3945 = vmatmul.mubr.msk.f32.vlgmr.msra.gmra.mrb[16].mxu1 %vm736_vm0, %v2341_v20 }
0x1045   : > { %3948 = vmatpush3.msra.mxu1 %v4354_v42  ;;  %3949 = vmatprep.mubr.msk.f32.mxu1 %vm4160_vm2, %v4159_v28 }
0x1046   : > { %v2460_v1 = vrot.slane %v2458_v21, 6  ;;  %3952 = vmatprep.subr.mxu1 %v4159_v28 }
0x1048   : > { %v4594_v62 = vadd.f32 %v2460_v1, %v4550_v12  ;;  %v824_v12 = vmul.f32 1.442695, %v821_v33 }
0x106b   : > { %s4062_s27 = spop %4061 }
0x106c   : > { %v2744_v21 = vstv %s4062_s27 }
0x1117   : > { %v2410_v8 = vpop.f32.mrb[16].mxu1 }
0x1118   : > { %v2415_v50 = vrot.slane %v2410_v8, 2  ;;  %v3946_v24 = vpop.f32.mrb[17].mxu1 }
0x1119   : > { %v2746_v24 = vmul.f32 %v4303_v10, %v2744_v21 }
0x111a   : > { %v2417_v25 = vadd.f32 %v2415_v50, %v2339_v22 }
0x111c   : > { %4111 = vtanh.f32 %v2417_v25  ;;  %v3808_v23 = vmul.f32 -1.442695, %v2417_v25 }
0x111e   : > { %4113 = vpow2.f32 %v3808_v23 }
0x1126   : > { %v4112_v49 = vpop.eup %4111 }
0x1127   : > { %2430 = vrot.lane.b32.xlu1 %v4112_v49, %s4161_s21 }
0x1128   : > { %v4114_v27 = vpop.eup %4113 }
0x1129   : > { %v2421_v34 = vadd.f32 1.0, %v4114_v27 }
0x112b   : > { %4115 = vrcp.f32 %v2421_v34 }
0x112c   : > { %4117 = vpow2.f32 %v824_v12 }
0x1135   : > { %v4116_v35 = vpop.eup %4115 }
0x1136   : > { %v4118_v39 = vpop.eup %4117  ;;  %v2428_v58 = vmul.f32 %v4116_v35, %v2426_v16 }
0x1137   : > { %v2466_v41 = vrot.slane %v4118_v39, 2 }
0x1199   : > { %v2431_v38 = vpop.permute.xlu1 %2430 }
0x119a   : > { %v2433_v30 = vmul.f32 %v4116_v35, %v2431_v38 }
0x119c   : > { %2435 = vrot.lane.b32.xlu0 %v2433_v30, %s4161_s21 }
0x11a0   : > { %2467 = vrot.lane.b32.xlu0 %v2466_v41, %s4162_s25 }
0x120e   : > { %v2436_v43 = vpop.permute.xlu0 %2435 }
0x120f   : > { %v4602_v45 = vadd.f32 %v2436_v43, %v2428_v58 }
0x1211   : > { %4119 = vtanh.f32 %v4602_v45 }
0x1212   : > { %v4606_v48 = vpop.permute.xlu0 %2467 }
0x121b   : > { %v4120_v44 = vpop.eup %4119 }
0x121c   : > { %2441 = vrot.lane.b32.xlu1 %v4120_v44, %s4161_s21 }
0x128e   : > { %v2442_v46 = vpop.permute.xlu1 %2441 }
0x128f   : > { %v2444_v47 = vmul.f32 %v4116_v35, %v2442_v46 }
0x1291   : > { %v2470_v53 = vmul.f32 %v4606_v48, %v2444_v47 }
0x1293   : > { %v2472_v54 = vrot.slane %v2470_v53, 6 }
0x1295   : > { %2473 = vrot.lane.b32.xlu1 %v2472_v54, %s4162_s25 }
0x1307   : > { %v2474_v31 = vpop.permute.xlu1 %2473 }
0x1308   : > { %3809 = vmatmul.mubr.msk.f32.vlgmr.msra.gmra.mrb[12].mxu0 %vm1289_vm1, %v2474_v31 }
0x1309   : > { %4025 = vmatpush1.bf16.msra.mxu0 %v4336_v36  ;;  %2820 = vmatprep.mubr.f32.mxu0 %v4159_v28 }
0x130a   : > { %4027 = vmatprep.subr.bf16.mxu0 %v4338_v37 }
0x130d   : > { %4029 = vmatpush1.bf16.msra.mxu0 %v4349_v40 }
0x130e   : > { %4031 = vmatprep.subr.bf16.mxu0 %v4333_v32 }
0x13db   : > { %v2543_v61 = vpop.f32.mrb[12].mxu0 }
0x13dc   : > { %v2545_v51 = vpop.f32.mrb[13].mxu0  ;;  %v2632_v26 = vadd.f32 %v2543_v61, %v4386_v60 }
0x13dd   : > { %v2548_v5 = vadd.f32 %v4402_v63, %v2545_v51 }
0x13df   : > { %v2551_v29 = vmul.f32 %v4621_v59, %v2548_v5  ;;  %v2734_v2 = vsub.f32 %v4618_v57, %v2548_v5  ;;  %v2628_v17 = vmul.f32 %v4636_v7, %v2548_v5 }
0x13e1   : > { %v2552_v6 = vadd.f32 %v2551_v29, %v4625_v3  ;;  %v2735_v13 = vand.u32 2147483647, %v2734_v2 }
0x13e3   : > { %3950 = vmatmul.mubr.msk.f32.vlgmr.msra.gmra.mrb[18].mxu1 %vm736_vm0, %v2552_v6 }
0x13e4   : > { %3953 = vmatpush3.msra.mxu1 %v4370_v52  ;;  %3954 = vmatprep.mubr.msk.f32.mxu1 %vm4160_vm2, %v4159_v28 }
0x13e5   : > { %3957 = vmatprep.subr.mxu1 %v4159_v28 }
0x14b6   : > { %v2622_v0 = vpop.f32.mrb[18].mxu1 }
0x14b7   : > { %v2623_v14 = vadd.f32 %v4429_v11, %v2622_v0  ;;  %v3951_v15 = vpop.f32.mrb[19].mxu1 }
0x14b9   : > { %v2626_v18 = vmul.f32 %v2623_v14, %v4380_v56  ;;  %v2736_v19 = vsub.f32 %v4618_v57, %v2623_v14 }
0x14bb   : > { %v2629_v20 = vadd.f32 %v2628_v17, %v2626_v18  ;;  %v2737_v9 = vand.u32 2147483647, %v2736_v19 }
0x14bd   : > { %v2630_v1 = vmul.f32 %v2629_v20, %v4621_v59  ;;  %v2738_v4 = vadd.f32 %v2737_v9, %v2735_v13  ;;  %v2739_v8 = vsub.f32 %v4618_v57, %v2629_v20 }
0x14bf   : > { %v2631_v22 = vadd.f32 %v2630_v1, %v4625_v3  ;;  %v2740_v50 = vand.u32 2147483647, %v2739_v8 }
0x14c1   : > { %v2741_v25 = vadd.f32 %v2740_v50, %v2738_v4  ;;  %3955 = vmatmul.mubr.msk.f32.vlgmr.msra.gmra.mrb[20].mxu1 %vm736_vm0, %v2631_v22  ;;  %2749 = vst.msk [vmem:[%s4446_s22 + $0x8] sm:$0x3] %vm1574_vm3, %v2631_v22 }
0x14c2   : > { %3958 = vmatpush3.msra.mxu1 %v4354_v42  ;;  %3959 = vmatprep.mubr.msk.f32.mxu1 %vm4160_vm2, %v4159_v28 }
0x14c3   : > { %v2747_v49 = vmul.f32 %v2746_v24, %v2741_v25  ;;  %3962 = vmatprep.subr.mxu1 %v4159_v28  ;;  %v4694_v24 = vld [vmem:[%s4273_s30 + $0x18] sm:$0xff] }
0x14c5   : > { %v4655_v23 = vadd.f32 %v2747_v49, %v4594_v62  ;;  %v2715_v62 = vrot.slane %v4602_v45, 6  ;;  %v4674_v45 = vld [vmem:[%s4261_s24] sm:$0xff] }
0x14c6   : > { %v3032_v31 = vrot.slane %v4674_v45, 5 }
0x14c8   : > { %4063 = vpush %v3032_v31 }
0x14f9   : > { %s4064_s24 = spop %4063 }
0x14fa   : > { %v3034_v21 = vstv %s4064_s24 }
0x14fb   : > { %v3036_v25 = vmul.f32 %v4694_v24, %v3034_v21 }
0x1594   : > { %v2702_v27 = vpop.f32.mrb[20].mxu1 }
0x1595   : > { %v2706_v10 = vadd.f32 %v2702_v27, %v2632_v26  ;;  %v3956_v33 = vpop.f32.mrb[21].mxu1 }
0x1597   : > { %4121 = vtanh.f32 %v2706_v10  ;;  %v3812_v12 = vmul.f32 -1.442695, %v2706_v10 }
0x1599   : > { %4123 = vpow2.f32 %v3812_v12 }
0x15a1   : > { %v4122_v34 = vpop.eup %4121 }
0x15a2   : > { %2719 = vrot.lane.b32.xlu0 %v4122_v34, %s4161_s21 }
0x15a3   : > { %v4124_v35 = vpop.eup %4123 }
0x15a4   : > { %v2710_v38 = vadd.f32 1.0, %v4124_v35 }
0x15a6   : > { %4125 = vrcp.f32 %v2710_v38 }
0x15b0   : > { %v4126_v30 = vpop.eup %4125 }
0x15b1   : > { %v2717_v16 = vmul.f32 %v4126_v30, %v2715_v62 }
0x1614   : > { %v2720_v39 = vpop.permute.xlu0 %2719 }
0x1615   : > { %v2722_v41 = vmul.f32 %v4126_v30, %v2720_v39 }
0x1617   : > { %2724 = vrot.lane.b32.xlu1 %v2722_v41, %s4161_s21 }
0x1689   : > { %v2725_v58 = vpop.permute.xlu1 %2724 }
0x168a   : > { %v4661_v43 = vadd.f32 %v2725_v58, %v2717_v16 }
0x168c   : > { %4127 = vtanh.f32 %v4661_v43 }
0x1696   : > { %v4128_v44 = vpop.eup %4127 }
0x1697   : > { %2730 = vrot.lane.b32.xlu0 %v4128_v44, %s4161_s21 }
0x1709   : > { %v2731_v46 = vpop.permute.xlu0 %2730 }
0x170a   : > { %v2733_v47 = vmul.f32 %v4126_v30, %v2731_v46  ;;  %v3005_v46 = vrot.slane %v4661_v43, 6  ;;  %v3326_v43 = vrot.slane %v4674_v45, 6 }
0x170c   : > { %v2750_v53 = vmul.f32 %v2733_v47, %v4606_v48  ;;  %4065 = vpush %v3326_v43 }
0x170e   : > { %2752 = vrot.lane.b32.xlu1 %v2750_v53, %s4162_s25 }
0x173d   : > { %s4066_s30 = spop %4065 }
0x1780   : > { %v2753_v54 = vpop.permute.xlu1 %2752 }
0x1781   : > { %3813 = vmatmul.mubr.msk.f32.vlgmr.msra.gmra.mrb[14].mxu0 %vm1289_vm1, %v2753_v54 }
0x1782   : > { %4033 = vmatpush1.bf16.msra.mxu0 %v4336_v36  ;;  %3114 = vmatprep.mubr.f32.mxu0 %v4159_v28 }
0x1783   : > { %4035 = vmatprep.subr.bf16.mxu0 %v4338_v37 }
0x1786   : > { %4037 = vmatpush1.bf16.msra.mxu0 %v4349_v40 }
0x1787   : > { %4039 = vmatprep.subr.bf16.mxu0 %v4333_v32 }
0x1854   : > { %v2822_v55 = vpop.f32.mrb[14].mxu0 }
0x1855   : > { %v2824_v61 = vpop.f32.mrb[15].mxu0  ;;  %v2916_v34 = vrot.slane %v2822_v55, 6 }
0x1856   : > { %v2827_v51 = vadd.f32 %v4402_v63, %v2824_v61 }
0x1857   : > { %v2918_v35 = vadd.f32 %v2916_v34, %v4386_v60  ;;  %v4148_v34 = vld [vmem:[%s4345_s17] sm:$0xff] }
0x1858   : > { %v2829_v5 = vrot.slane %v2827_v51, 6 }
0x185a   : > { %v2831_v29 = vmul.f32 %v2829_v5, %v4621_v59  ;;  %v3024_v15 = vsub.f32 %v4618_v57, %v2829_v5  ;;  %v2911_v18 = vmul.f32 %v2829_v5, %v4636_v7 }
0x185c   : > { %v2832_v6 = vadd.f32 %v2831_v29, %v4625_v3  ;;  %v3025_v13 = vand.u32 2147483647, %v3024_v15 }
0x185e   : > { %v2834_v0 = vrot.slane %v2832_v6, 2 }
0x1860   : > { %3960 = vmatmul.mubr.msk.f32.vlgmr.msra.gmra.mrb[22].mxu1 %vm736_vm0, %v2834_v0 }
0x1861   : > { %3963 = vmatpush3.msra.mxu1 %v4370_v52  ;;  %3964 = vmatprep.mubr.msk.f32.mxu1 %vm4160_vm2, %v4159_v28 }
0x1862   : > { %3967 = vmatprep.subr.mxu1 %v4159_v28 }
0x1933   : > { %v2903_v32 = vpop.f32.mrb[22].mxu1 }
0x1934   : > { %v2904_v2 = vadd.f32 %v4429_v11, %v2903_v32  ;;  %v3961_v14 = vpop.f32.mrb[23].mxu1 }
0x1936   : > { %v2908_v17 = vrot.slane %v2904_v2, 6 }
0x1938   : > { %v2910_v19 = vmul.f32 %v2908_v17, %v4380_v56  ;;  %v3026_v52 = vsub.f32 %v4618_v57, %v2908_v17 }
0x193a   : > { %v2912_v20 = vadd.f32 %v2911_v18, %v2910_v19  ;;  %v3027_v9 = vand.u32 2147483647, %v3026_v52 }
0x193c   : > { %v2913_v1 = vmul.f32 %v2912_v20, %v4621_v59  ;;  %v3028_v4 = vadd.f32 %v3027_v9, %v3025_v13  ;;  %v3029_v8 = vsub.f32 %v4618_v57, %v2912_v20 }
0x193e   : > { %v2914_v22 = vadd.f32 %v2913_v1, %v4625_v3  ;;  %v3030_v50 = vand.u32 2147483647, %v3029_v8 }
0x1940   : > { %v2920_v49 = vrot.slane %v2914_v22, 2  ;;  %3042 = vst.msk [vmem:[%s4446_s22 + $0x8] sm:$0xc] %vm1873_vm4, %v2914_v22  ;;  %v3031_v26 = vadd.f32 %v3030_v50, %v3028_v4  ;;  %v3328_v4 = vstv %s4066_s30 }
0x1942   : > { %v3037_v27 = vmul.f32 %v3036_v25, %v3031_v26  ;;  %3965 = vmatmul.mubr.msk.f32.vlgmr.msra.gmra.mrb[24].mxu1 %vm736_vm0, %v2920_v49  ;;  %v3330_v49 = vmul.f32 %v4694_v24, %v3328_v4 }
0x1943   : > { %3968 = vmatpush3.msra.mxu1 %v4354_v42  ;;  %3969 = vmatprep.mubr.msk.f32.mxu1 %vm4160_vm2, %v4159_v28 }
0x1944   : > { %v3039_v10 = vrot.slane %v3037_v27, 2  ;;  %3972 = vmatprep.subr.mxu1 %v4159_v28 }
0x1946   : > { %v4705_v33 = vadd.f32 %v3039_v10, %v4655_v23 }
0x1a15   : > { %v2989_v12 = vpop.f32.mrb[24].mxu1 }
0x1a16   : > { %v2994_v38 = vrot.slane %v2989_v12, 6  ;;  %v3966_v30 = vpop.f32.mrb[25].mxu1 }
0x1a18   : > { %v2996_v39 = vadd.f32 %v2994_v38, %v2918_v35 }
0x1a1a   : > { %4129 = vtanh.f32 %v2996_v39  ;;  %v3816_v42 = vmul.f32 -1.442695, %v2996_v39 }
0x1a1c   : > { %4131 = vpow2.f32 %v3816_v42 }
0x1a24   : > { %v4130_v41 = vpop.eup %4129 }
0x1a25   : > { %3009 = vrot.lane.b32.xlu0 %v4130_v41, %s4161_s21 }
0x1a26   : > { %v4132_v62 = vpop.eup %4131 }
0x1a27   : > { %v3000_v16 = vadd.f32 1.0, %v4132_v62 }
0x1a29   : > { %4133 = vrcp.f32 %v3000_v16 }
0x1a33   : > { %v4134_v58 = vpop.eup %4133 }
0x1a34   : > { %v3007_v47 = vmul.f32 %v4134_v58, %v3005_v46 }
0x1a97   : > { %v3010_v44 = vpop.permute.xlu0 %3009 }
0x1a98   : > { %v3012_v23 = vmul.f32 %v4134_v58, %v3010_v44 }
0x1a9a   : > { %3014 = vrot.lane.b32.xlu1 %v3012_v23, %s4161_s21 }
0x1b0c   : > { %v3015_v53 = vpop.permute.xlu1 %3014 }
0x1b0d   : > { %v4711_v54 = vadd.f32 %v3015_v53, %v3007_v47 }
0x1b0f   : > { %4135 = vtanh.f32 %v4711_v54  ;;  %v3299_v47 = vrot.slane %v4711_v54, 6  ;;  %v3510_v54 = vrot.slane %v4674_v45, 7 }
0x1b11   : > { %4067 = vpush %v3510_v54 }
0x1b19   : > { %v4136_v31 = vpop.eup %4135 }
0x1b1a   : > { %3020 = vrot.lane.b32.xlu0 %v4136_v31, %s4161_s21 }
0x1b8c   : > { %v3021_v55 = vpop.permute.xlu0 %3020 }
0x1b8d   : > { %v3023_v61 = vmul.f32 %v4134_v58, %v3021_v55 }
0x1b8f   : > { %v3043_v51 = vmul.f32 %v3023_v61, %v4606_v48 }
0x1b91   : > { %v3045_v5 = vrot.slane %v3043_v51, 2 }
0x1b93   : > { %3046 = vrot.lane.b32.xlu1 %v3045_v5, %s4162_s25 }
0x1c05   : > { %v3047_v29 = vpop.permute.xlu1 %3046 }
0x1c06   : > { %3817 = vmatmul.mubr.msk.f32.vlgmr.msra.gmra.mrb[16].mxu0 %vm1289_vm1, %v3047_v29 }
0x1c07   : > { %4041 = vmatpush1.bf16.msra.mxu0 %v4336_v36  ;;  %3408 = vmatprep.mubr.f32.mxu0 %v4159_v28  ;;  %v4147_v36 = vld [vmem:[%s4312_s23] sm:$0xff]  ;;  %s4068_s23 = spop %4067 }
0x1c08   : > { %4043 = vmatprep.subr.bf16.mxu0 %v4338_v37 }
0x1c0b   : > { %4045 = vmatpush1.bf16.msra.mxu0 %v4349_v40 }
0x1cd9   : > { %v3116_v6 = vpop.f32.mrb[16].mxu0 }
0x1cda   : > { %v3118_v0 = vpop.f32.mrb[17].mxu0  ;;  %v3210_v38 = vrot.slane %v3116_v6, 4 }
0x1cdb   : > { %v3121_v32 = vadd.f32 %v4402_v63, %v3118_v0 }
0x1cdc   : > { %v3212_v39 = vadd.f32 %v3210_v38, %v4386_v60 }
0x1cdd   : > { %v3123_v2 = vrot.slane %v3121_v32, 4  ;;  %v4149_v32 = vld [vmem:[%s4396_s26] ss:$0 sm:$0xff] }
0x1cdf   : > { %v3125_v14 = vmul.f32 %v3123_v2, %v4621_v59  ;;  %v3318_v63 = vsub.f32 %v4618_v57, %v3123_v2  ;;  %v3205_v52 = vmul.f32 %v3123_v2, %v4636_v7 }
0x1ce1   : > { %v3126_v15 = vadd.f32 %v3125_v14, %v4625_v3  ;;  %v3319_v9 = vand.u32 2147483647, %v3318_v63 }
0x1ce3   : > { %v3128_v17 = vrot.slane %v3126_v15, 4 }
0x1ce5   : > { %3970 = vmatmul.mubr.msk.f32.vlgmr.msra.gmra.mrb[26].mxu1 %vm736_vm0, %v3128_v17 }
0x1ce6   : > { %3973 = vmatpush3.msra.mxu1 %v4147_v36  ;;  %3974 = vmatprep.mubr.msk.f32.mxu1 %vm4160_vm2, %v4159_v28 }
0x1ce7   : > { %3977 = vmatprep.subr.mxu1 %v4159_v28 }
0x1db8   : > { %v3197_v37 = vpop.f32.mrb[26].mxu1 }
0x1db9   : > { %v3198_v40 = vadd.f32 %v4429_v11, %v3197_v37  ;;  %v3971_v18 = vpop.f32.mrb[27].mxu1  ;;  %v4150_v37 = vld [vmem:[%s4424_s29] ss:$0 sm:$0xff]  ;;  %s712_s29 = scalar_lea.vmem %s4797_s15, %s4799_s19 }
0x1dbb   : > { %v3202_v19 = vrot.slane %v3198_v40, 4 }
0x1dbd   : > { %v3204_v13 = vmul.f32 %v3202_v19, %v4380_v56  ;;  %v3320_v20 = vsub.f32 %v4618_v57, %v3202_v19 }
0x1dbf   : > { %v3206_v21 = vadd.f32 %v3205_v52, %v3204_v13  ;;  %v3321_v1 = vand.u32 2147483647, %v3320_v20 }
0x1dc1   : > { %v3207_v8 = vmul.f32 %v3206_v21, %v4621_v59  ;;  %v3322_v11 = vadd.f32 %v3321_v1, %v3319_v9  ;;  %v3323_v22 = vsub.f32 %v4618_v57, %v3206_v21  ;;  %v3512_v1 = vstv %s4068_s23 }
0x1dc3   : > { %v3208_v50 = vadd.f32 %v3207_v8, %v4625_v3  ;;  %v3324_v25 = vand.u32 2147483647, %v3323_v22 }
0x1dc5   : > { %v3214_v26 = vrot.slane %v3208_v50, 4  ;;  %3336 = vst.msk [vmem:[%s4446_s22 + $0x8] sm:$0x30] %vm2168_vm5, %v3208_v50  ;;  %v3325_v27 = vadd.f32 %v3324_v25, %v3322_v11  ;;  %v3514_v25 = vmul.f32 %v4694_v24, %v3512_v1 }
0x1dc7   : > { %v3331_v10 = vmul.f32 %v3330_v49, %v3325_v27  ;;  %3975 = vmatmul.mubr.msk.f32.vlgmr.msra.gmra.mrb[28].mxu1 %vm736_vm0, %v3214_v26 }
0x1dc8   : > { %3978 = vmatpush3.msra.mxu1 %v4148_v34  ;;  %3979 = vmatprep.mubr.msk.f32.mxu1 %vm4160_vm2, %v4159_v28 }
0x1dc9   : > { %v3333_v12 = vrot.slane %v3331_v10, 4 }
0x1dcb   : > { %v4747_v35 = vadd.f32 %v3333_v12, %v4705_v33 }
0x1e9a   : > { %v3283_v30 = vpop.f32.mrb[28].mxu1 }
0x1e9b   : > { %v3288_v41 = vrot.slane %v3283_v30, 4  ;;  %v3976_v42 = vpop.f32.mrb[29].mxu1 }
0x1e9d   : > { %v3290_v62 = vadd.f32 %v3288_v41, %v3212_v39 }
0x1e9f   : > { %4137 = vtanh.f32 %v3290_v62  ;;  %v3820_v58 = vmul.f32 -1.442695, %v3290_v62 }
0x1ea1   : > { %4139 = vpow2.f32 %v3820_v58 }
0x1ea9   : > { %v4138_v16 = vpop.eup %4137 }
0x1eaa   : > { %3303 = vrot.lane.b32.xlu0 %v4138_v16, %s4161_s21 }
0x1eab   : > { %v4140_v44 = vpop.eup %4139 }
0x1eac   : > { %v3294_v23 = vadd.f32 1.0, %v4140_v44 }
0x1eae   : > { %4141 = vrcp.f32 %v3294_v23 }
0x1eb8   : > { %v4142_v28 = vpop.eup %4141 }
0x1eb9   : > { %v3301_v60 = vmul.f32 %v4142_v28, %v3299_v47 }
0x1f1c   : > { %v3304_v46 = vpop.permute.xlu0 %3303 }
0x1f1d   : > { %v3306_v33 = vmul.f32 %v4142_v28, %v3304_v46 }
0x1f1f   : > { %3308 = vrot.lane.b32.xlu1 %v3306_v33, %s4161_s21 }
0x1f91   : > { %v3309_v53 = vpop.permute.xlu1 %3308 }
0x1f92   : > { %v3311_v31 = vadd.f32 %v3309_v53, %v3301_v60 }
0x1f94   : > { %4143 = vtanh.f32 %v3311_v31 }
0x1f9e   : > { %v4144_v55 = vpop.eup %4143 }
0x1f9f   : > { %3314 = vrot.lane.b32.xlu0 %v4144_v55, %s4161_s21 }
0x2011   : > { %v3315_v61 = vpop.permute.xlu0 %3314 }
0x2012   : > { %v3317_v51 = vmul.f32 %v4142_v28, %v3315_v61 }
0x2014   : > { %v3337_v5 = vmul.f32 %v3317_v51, %v4606_v48 }
0x2016   : > { %v3339_v29 = vrot.slane %v3337_v5, 4 }
0x2018   : > { %3340 = vrot.lane.b32.xlu1 %v3339_v29, %s4162_s25 }
0x208a   : > { %v3341_v43 = vpop.permute.xlu1 %3340 }
0x208b   : > { %3821 = vmatmul.mubr.msk.f32.vlgmr.msra.gmra.mrb[18].mxu0 %vm1289_vm1, %v3341_v43 }
0x215e   : > { %v3410_v6 = vpop.f32.mrb[18].mxu0 }
0x215f   : > { %v3411_v0 = vpop.f32.mrb[19].mxu0 }
0x2160   : > { %v3414_v2 = vadd.f32 %v4149_v32, %v3411_v0 }
0x2162   : > { %v3416_v14 = vrot.slane %v3414_v2, 2 }
0x2164   : > { %v3418_v15 = vmul.f32 %v3416_v14, %v4621_v59  ;;  %v3502_v63 = vsub.f32 %v4618_v57, %v3416_v14  ;;  %v3498_v19 = vmul.f32 %v3416_v14, %v4636_v7 }
0x2166   : > { %v3419_v17 = vadd.f32 %v3418_v15, %v4625_v3  ;;  %v3503_v20 = vand.u32 2147483647, %v3502_v63 }
0x2168   : > { %v3421_v48 = vrot.slane %v3419_v17, 6 }
0x216a   : > { %3980 = vmatmul.mubr.msk.f32.vlgmr.msra.gmra.mrb[30].mxu1 %vm736_vm0, %v3421_v48 }
0x223d   : > { %v3490_v36 = vpop.f32.mrb[30].mxu1 }
0x223e   : > { %v3491_v40 = vadd.f32 %v4150_v37, %v3490_v36  ;;  %v3981_v18 = vpop.f32.mrb[31].mxu1 }
0x2240   : > { %v3495_v45 = vrot.slane %v3491_v40, 2 }
0x2242   : > { %v3497_v52 = vmul.f32 %v3495_v45, %v4380_v56  ;;  %v3504_v13 = vsub.f32 %v4618_v57, %v3495_v45 }
0x2244   : > { %v3499_v9 = vadd.f32 %v3498_v19, %v3497_v52  ;;  %v3505_v21 = vand.u32 2147483647, %v3504_v13 }
0x2246   : > { %v3500_v4 = vmul.f32 %v3499_v9, %v4621_v59  ;;  %v3506_v8 = vadd.f32 %v3505_v21, %v3503_v20  ;;  %v3507_v11 = vsub.f32 %v4618_v57, %v3499_v9 }
0x2248   : > { %v3501_v22 = vadd.f32 %v3500_v4, %v4625_v3  ;;  %v3508_v50 = vand.u32 2147483647, %v3507_v11 }
0x224a   : > { %3520 = vst.msk [vmem:[%s4446_s22 + $0x8] sm:$0xc0] %vm2463_vm6, %v3501_v22  ;;  %v3509_v56 = vadd.f32 %v3508_v50, %v3506_v8 }
0x224c   : > { %v3515_v7 = vmul.f32 %v3514_v25, %v3509_v56 }
0x224e   : > { %v3517_v49 = vrot.slane %v3515_v7, 6 }
0x2250   : > { %v3519_v26 = vadd.f32 %v3517_v49, %v4747_v35 }
0x2252   : > { %v3521_v27 = vsel %vm1574_vm3, %v3519_v26, 0.0 }
0x2253   : > { %3522 = vadd.xlane.f32.xlu0 %v3521_v27 }
0x22e0   : > { %v3523_v59 = vpop.xlane.xlu0 %3522 }
0x22e1   : > { %v3525_v10 = vsel %vm3524_vm7, %v3523_v59, 0.0 }
0x22e2   : > { %v3526_v57 = vrot.slane %v3525_v10, 4 }
0x22e4   : > { %v3527_v34 = vadd.f32 %v3526_v57, %v3525_v10 }
0x22e6   : > { %v3528_v3 = vrot.slane %v3527_v34, 2 }
0x22e8   : > { %v3529_v12 = vadd.f32 %v3528_v3, %v3527_v34 }
0x22ea   : > { %v3530_v38 = vrot.slane %v3529_v12, 1 }
0x22ec   : > { %v3531_v24 = vadd.f32 %v3530_v38, %v3529_v12 }
0x22ee   : > { %3533 = vst.msk [vmem:[%s712_s29] sm:$0x1] %vm3532_vm8, %v3531_v24 }
0x22ef PF: > { %s26_s18 = sadd.s32 1, %s4157_s18  }
0x22f0   : > { %p23_p4 = scmp.ge.s32.totalorder %s26_s18, 4  }
0x22f2   :  { %25 = sbr.rel (!%p23_p4) target bundleno = 1 (0x1), region = 161 }

</bundles_post_ra>
